<compile_context>
chip_gen: v5e
topology: v5e:2x2
jax: 0.10.0
libtpu: 0.0.40
codegen_flags: <defaults>
</compile_context>

<pallas_src>
from functools import partial

import jax
import jax.numpy as jnp
from jax import lax
from jax.experimental import pallas as pl
from jax.experimental.pallas import tpu as pltpu

EPS = 1e-5
LANE = 128


def _round_up(x, m):
    return (x + m - 1) // m * m


def _vmem_limit_bytes():
    """Per-generation scoped-VMEM limit: ~3/4 of physical, capped at 100 MiB
    (=> ~96 MiB on v5e/v6e's 128 MiB, ~48 MiB on v7x's 64 MiB)."""
    try:
        cap = pltpu.get_tpu_info().vmem_capacity_bytes
    except Exception:  # pragma: no cover - conservative fallback
        cap = 64 * 1024 * 1024
    return int(min(cap * 3 // 4, 100 * 1024 * 1024))


def _pick_row_tile(H, W, C8, Cp, budget_bytes):
    """Largest divisor of H whose per-step working set fits the budget, while
    keeping >= 2 row tiles per image (pipeline depth / megacore for small N)."""
    best = None
    for th in range(1, H + 1):
        if H % th != 0:
            continue
        if (th * W) % 8 != 0 and th != H:
            continue  # keep the patches block sublane-aligned
        per_step = (4 * th * W * (Cp + 7 * C8)          # acc + patch + blocks
                    + 4 * (th + 2) * W * C8             # H-padded scratch
                    + 12 * C8 * Cp)                     # resident conv2 weights
        if best is None:
            best = th
        if per_step <= budget_bytes and (H // th) >= 2:
            best = th
    return best if best is not None else H


# ----------------------------------------------------------------------------
# Kernels
# ----------------------------------------------------------------------------
def _bn_partials(acc):
    """Centered per-tile BN partials: (sum, sum of squared deviations)."""
    ssum = jnp.sum(acc, axis=0, keepdims=True)
    mu = ssum * (1.0 / acc.shape[0])
    m2 = jnp.sum((acc - mu) ** 2, axis=0, keepdims=True)
    return jnp.concatenate([ssum, m2], axis=0)          # (2, Cp)


def conv1_kernel(p_ref, w_ref, y_ref, s_ref):
    # p_ref: (1, TH*W, Kp)  wrapper-built im2col patches (lane-dense K)
    # w_ref: (Kp, Cp)       im2col-flattened conv1 weights
    # y_ref: (1, TH, W, C8) pre-BN conv1 output (channel-trimmed)
    # s_ref: (1, 1, 2, Cp)  per-tile BN1 partials
    _, TH, W, C8 = y_ref.shape
    acc = jnp.dot(p_ref[0], w_ref[...],
                  preferred_element_type=jnp.float32)   # (TH*W, Cp), one MXU pass
    s_ref[0, 0] = _bn_partials(acc)
    y_ref[0] = acc[:, :C8].reshape(TH, W, C8).astype(y_ref.dtype)


def conv2_kernel(y1_ref, top_ref, bot_ref, sc_ref, sh_ref, w_ref,
                 y2_ref, s_ref, pad_ref):
    # y1_ref:  (1, TH, W, C8)  pre-BN conv1 rows for this tile
    # top_ref: (1, 1, W, C8)   row above the tile (clamped; zeroed when th==0)
    # bot_ref: (1, 1, W, C8)   row below the tile (clamped; zeroed when th==last)
    # sc/sh:   (1, C8)         BN1 folded into a single scale/shift
    # w_ref:   (3, 3*C8, Cp)   conv2 weights, per-dy im2col layout
    # y2_ref:  (1, TH, W, C8)  pre-BN conv2 output (channel-trimmed)
    # s_ref:   (1, 1, 2, Cp)   per-tile BN2 partials
    # pad_ref: (TH+2, W, C8)   f32 scratch, padded in H ONLY (aligned stores)
    th = pl.program_id(1)
    n_th = pl.num_programs(1)
    _, TH, W, C8 = y1_ref.shape
    Cp = w_ref.shape[-1]
    mdt = w_ref.dtype                                   # matmul operand dtype

    sc = sc_ref[...].reshape(1, 1, C8)
    sh = sh_ref[...].reshape(1, 1, C8)

    def bn_relu(v):                                     # fused BN1 affine + ReLU
        return jnp.maximum(v.astype(jnp.float32) * sc + sh, 0.0)

    # Write BN1+ReLU straight into the H-padded scratch (no h1 buffer; all
    # stores start at W-offset 0 -> no sublane shuffles).
    pad_ref[1:TH + 1] = bn_relu(y1_ref[0])
    pad_ref[0:1] = bn_relu(top_ref[0])
    pad_ref[TH + 1:TH + 2] = bn_relu(bot_ref[0])

    # Image-boundary halo rows are zero.  Done per grid step on purpose: with
    # "parallel" megacore sharding each core owns its own scratch.
    zrow = jnp.zeros((1, W, C8), jnp.float32)

    @pl.when(th == 0)
    def _():
        pad_ref[0:1] = zrow

    @pl.when(th == n_th - 1)
    def _():
        pad_ref[TH + 1:TH + 2] = zrow

    # 3x3 conv as 3 accumulated matmuls (one per dy, K = 3*C8): no 9-tap patch
    # buffer; the W-border zeros are synthesized per tap with a zero column.
    zcol = jnp.zeros((TH, 1, C8), jnp.float32)
    acc = jnp.zeros((TH * W, Cp), jnp.float32)
    for dy in range(3):                                 # static unroll
        center = pad_ref[dy:dy + TH]                                    # x[i+dy-1, j  ]
        left = jnp.concatenate([zcol, center[:, :W - 1, :]], axis=1)    # x[i+dy-1, j-1]
        right = jnp.concatenate([center[:, 1:, :], zcol], axis=1)       # x[i+dy-1, j+1]
        patch = jnp.concatenate([left, center, right], axis=-1)
        patch = patch.reshape(TH * W, 3 * C8).astype(mdt)
        acc = acc + jnp.dot(patch, w_ref[dy],
                            preferred_element_type=jnp.float32)

    s_ref[0, 0] = _bn_partials(acc)
    y2_ref[0] = acc[:, :C8].reshape(TH, W, C8).astype(y2_ref.dtype)


# ----------------------------------------------------------------------------
# Wrapper
# ----------------------------------------------------------------------------
def _fold_bn(stats, gamma_p, beta_p, tile_count, total_count):
    """Chan-style combine of per-tile (sum, centered M2) partials -> exact
    biased batch variance, folded with gamma/beta into one scale/shift."""
    sums = stats[:, :, 0, :]                            # (N, n_th, Cp)
    m2s = stats[:, :, 1, :]
    tile_means = sums / tile_count
    gmean = jnp.sum(sums, axis=(0, 1)) / total_count    # (Cp,)
    m2 = jnp.sum(m2s, axis=(0, 1)) + tile_count * jnp.sum(
        (tile_means - gmean) ** 2, axis=(0, 1))
    var = m2 / total_count                              # biased (training-mode BN)
    scale = gamma_p * lax.rsqrt(var + EPS)
    shift = beta_p - gmean * scale
    return scale, shift                                 # (Cp,) each


@partial(jax.jit, static_argnames=("use_bf16",))
def double_conv(x_nchw, w1, g1, b1, w2, g2, b2, *, use_bf16=False):
    """x_nchw: (N, Cin, H, W) f32; w1: (3,3,Cin,Cout) HWIO; w2: (3,3,Cout,Cout)
    HWIO; g*/b*: (Cout,).  Returns (N, Cout, H, W) f32 (training-mode BN)."""
    N, Cin, H, W = x_nchw.shape
    Cout = w1.shape[-1]
    Cp = _round_up(Cout, LANE)                          # lane-dense accumulator dim
    C8 = _round_up(Cout, 16 if use_bf16 else 8)         # trimmed HBM channel dim
    Kp = _round_up(9 * Cin, LANE)                       # lane-dense conv1 K
    cdt = jnp.bfloat16 if use_bf16 else jnp.float32     # MXU / y1 dtype

    vmem_limit = _vmem_limit_bytes()
    TH = _pick_row_tile(H, W, C8, Cp, max(2 * 1024 * 1024, vmem_limit // 6))
    n_th = H // TH

    x = jnp.transpose(x_nchw, (0, 2, 3, 1))             # NHWC

    # conv1 im2col in the wrapper (Cin is tiny for the first conv).
    xpad = jnp.pad(x, ((0, 0), (1, 1), (1, 1), (0, 0)))
    taps = [xpad[:, dy:dy + H, dx:dx + W, :] for dy in range(3) for dx in range(3)]
    patches = jnp.concatenate(taps, axis=-1).reshape(N, H * W, 9 * Cin)
    patches = jnp.pad(patches, ((0, 0), (0, 0), (0, Kp - 9 * Cin))).astype(cdt)

    # Weights; pad rows/cols beyond the real channels are ZERO and gamma/beta
    # are ZERO-padded -> pad lanes stay exactly 0 through BN+ReLU and conv2.
    w1m = jnp.pad(w1.reshape(9 * Cin, Cout),
                  ((0, Kp - 9 * Cin), (0, Cp - Cout))).astype(cdt)
    w2m = jnp.pad(w2, ((0, 0), (0, 0), (0, C8 - Cout), (0, Cp - Cout))
                  ).reshape(3, 3 * C8, Cp).astype(cdt)
    g1p = jnp.pad(g1, (0, Cp - Cout))
    b1p = jnp.pad(b1, (0, Cp - Cout))
    g2p = jnp.pad(g2, (0, Cp - Cout))
    b2p = jnp.pad(b2, (0, Cp - Cout))

    cparams = pltpu.CompilerParams(
        dimension_semantics=("parallel", "parallel"),
        vmem_limit_bytes=vmem_limit,
    )

    tile_spec = pl.BlockSpec((1, TH, W, C8), lambda n, t: (n, t, 0, 0))
    stats_spec = pl.BlockSpec((1, 1, 2, Cp), lambda n, t: (n, t, 0, 0))

    # ---- pass 1: conv1 (single lane-dense matmul) + BN1 partials -----------
    y1, s1 = pl.pallas_call(
        conv1_kernel,
        grid=(N, n_th),
        in_specs=[pl.BlockSpec((1, TH * W, Kp), lambda n, t: (n, t, 0)),
                  pl.BlockSpec((Kp, Cp), lambda n, t: (0, 0))],
        out_specs=[tile_spec, stats_spec],
        out_shape=[jax.ShapeDtypeStruct((N, H, W, C8), cdt),
                   jax.ShapeDtypeStruct((N, n_th, 2, Cp), jnp.float32)],
        compiler_params=cparams,
    )(patches, w1m)

    tile_count = jnp.float32(TH * W)
    total_count = jnp.float32(N * H * W)
    sc1, sh1 = _fold_bn(s1, g1p, b1p, tile_count, total_count)
    sc1c = sc1[:C8].reshape(1, C8)
    sh1c = sh1[:C8].reshape(1, C8)

    # ---- pass 2: fused BN1+ReLU -> conv2 (per-dy matmuls) + BN2 partials ----
    halo_top_spec = pl.BlockSpec(
        (1, 1, W, C8), lambda n, t: (n, jnp.maximum(t * TH - 1, 0), 0, 0))
    halo_bot_spec = pl.BlockSpec(
        (1, 1, W, C8), lambda n, t: (n, jnp.minimum((t + 1) * TH, H - 1), 0, 0))
    vec_spec = pl.BlockSpec((1, C8), lambda n, t: (0, 0))

    y2, s2 = pl.pallas_call(
        conv2_kernel,
        grid=(N, n_th),
        in_specs=[tile_spec, halo_top_spec, halo_bot_spec, vec_spec, vec_spec,
                  pl.BlockSpec((3, 3 * C8, Cp), lambda n, t: (0, 0, 0))],
        out_specs=[tile_spec, stats_spec],
        out_shape=[jax.ShapeDtypeStruct((N, H, W, C8), jnp.float32),
                   jax.ShapeDtypeStruct((N, n_th, 2, Cp), jnp.float32)],
        scratch_shapes=[pltpu.VMEM((TH + 2, W, C8), jnp.float32)],
        compiler_params=cparams,
    )(y1, y1, y1, sc1c, sh1c, w2m)

    sc2, sh2 = _fold_bn(s2, g2p, b2p, tile_count, total_count)

    # BN2 affine + ReLU + channel trim: a tiny elementwise tail that XLA fuses
    # with the (unavoidable) NHWC -> NCHW layout transpose.
    out = jnp.maximum(y2[..., :Cout] * sc2[:Cout] + sh2[:Cout], 0.0)
    return jnp.transpose(out, (0, 3, 1, 2))


# ----------------------------------------------------------------------------
# Pure-JAX reference (training-mode BatchNorm, biased variance)
# ----------------------------------------------------------------------------
def reference_double_conv(x_nchw, w1, g1, b1, w2, g2, b2):
    x = jnp.transpose(x_nchw, (0, 2, 3, 1))

    def bn_relu(h, g, b):
        mean = jnp.mean(h, axis=(0, 1, 2), keepdims=True)
        var = jnp.mean((h - mean) ** 2, axis=(0, 1, 2), keepdims=True)
        h = (h - mean) * lax.rsqrt(var + EPS)
        h = h * g.reshape(1, 1, 1, -1) + b.reshape(1, 1, 1, -1)
        return jnp.maximum(h, 0.0)

    dn1 = lax.conv_dimension_numbers(x.shape, w1.shape, ("NHWC", "HWIO", "NHWC"))
    h = lax.conv_general_dilated(x, w1, (1, 1), "SAME", dimension_numbers=dn1,
                                 precision=lax.Precision.HIGHEST)
    h = bn_relu(h, g1, b1)
    dn2 = lax.conv_dimension_numbers(h.shape, w2.shape, ("NHWC", "HWIO", "NHWC"))
    h = lax.conv_general_dilated(h, w2, (1, 1), "SAME", dimension_numbers=dn2,
                                 precision=lax.Precision.HIGHEST)
    h = bn_relu(h, g2, b2)
    return jnp.transpose(h, (0, 3, 1, 2))


if __name__ == "__main__":
    N, C_IN, C_OUT, H, W = 2, 4, 8, 16, 16

    key = jax.random.PRNGKey(0)
    kx, kw1, kw2 = jax.random.split(key, 3)

    x = jax.random.normal(kx, (N, C_IN, H, W), dtype=jnp.float32)

    # Conv weights: PyTorch-style kaiming-uniform bound = 1/sqrt(fan_in), HWIO.
    bound1 = 1.0 / (C_IN * 9) ** 0.5
    w1_oihw = jax.random.uniform(kw1, (C_OUT, C_IN, 3, 3), jnp.float32,
                                 -bound1, bound1)
    bound2 = 1.0 / (C_OUT * 9) ** 0.5
    w2_oihw = jax.random.uniform(kw2, (C_OUT, C_OUT, 3, 3), jnp.float32,
                                 -bound2, bound2)
    w1 = jnp.transpose(w1_oihw, (2, 3, 1, 0))   # HWIO
    w2 = jnp.transpose(w2_oihw, (2, 3, 1, 0))   # HWIO

    # BatchNorm affine params (PyTorch defaults: weight=1, bias=0).
    g1 = jnp.ones((C_OUT,), jnp.float32)
    b1 = jnp.zeros((C_OUT,), jnp.float32)
    g2 = jnp.ones((C_OUT,), jnp.float32)
    b2 = jnp.zeros((C_OUT,), jnp.float32)

    ref = reference_double_conv(x, w1, g1, b1, w2, g2, b2)

    # Default f32 MXU path: must match the f32 reference to 1e-4.
    out = jax.block_until_ready(double_conv(x, w1, g1, b1, w2, g2, b2))
    assert out.shape == (N, C_OUT, H, W)
    assert jnp.allclose(out, ref, atol=1e-4, rtol=1e-4), \
        f"max abs err (f32 path) = {jnp.max(jnp.abs(out - ref))}"

    # Optional bf16 MXU fast path (v6e/v7x): f32 accumulation, loose tolerance.
    out_bf16 = jax.block_until_ready(
        double_conv(x, w1, g1, b1, w2, g2, b2, use_bf16=True))
    assert out_bf16.shape == (N, C_OUT, H, W)
    assert jnp.allclose(out_bf16, ref, atol=1e-1, rtol=1e-1), \
        f"max abs err (bf16 path) = {jnp.max(jnp.abs(out_bf16 - ref))}"

    print("KERNEL_OK")
</pallas_src>

<mosaic_0001>
module attributes {stable_mosaic.version = 11 : i64} {
  func.func @conv1_kernel(%arg0: i32, %arg1: i32, %arg2: memref<1x128x128xf32, #tpu.memory_space<vmem>>, %arg3: memref<128x128xf32, #tpu.memory_space<vmem>>, %arg4: memref<1x8x16x8xf32, #tpu.memory_space<vmem>>, %arg5: memref<1x1x2x128xf32, #tpu.memory_space<vmem>>) attributes {dimension_semantics = [#tpu.dimension_semantics<parallel>, #tpu.dimension_semantics<parallel>], iteration_bounds = array<i64: 2, 2>, scalar_prefetch = 0 : i64, scratch_operands = 0 : i64, tpu.core_type = #tpu.core_type<tc>, window_params = [{transform_indices = @transform_0, window_bounds = array<i64: 1, 128, 128>}, {pipeline_mode = #tpu.pipeline_mode<synchronous>, transform_indices = @transform_1, window_bounds = array<i64: 128, 128>}, {transform_indices = @transform_2, window_bounds = array<i64: 1, 8, 16, 8>}, {transform_indices = @transform_3, window_bounds = array<i64: 1, 1, 2, 128>}]} {
    %c0 = arith.constant 0 : index
    %c0_0 = arith.constant 0 : index
    %c0_1 = arith.constant 0 : index
    %0 = vector.load %arg2[%c0, %c0_0, %c0_1] : memref<1x128x128xf32, #tpu.memory_space<vmem>>, vector<1x128x128xf32>
    %1 = vector.shape_cast %0 : vector<1x128x128xf32> to vector<128x128xf32>
    %c0_2 = arith.constant 0 : index
    %c0_3 = arith.constant 0 : index
    %2 = vector.load %arg3[%c0_2, %c0_3] : memref<128x128xf32, #tpu.memory_space<vmem>>, vector<128x128xf32>
    %cst = arith.constant dense<0.000000e+00> : vector<128x128xf32>
    %3 = tpu.matmul %1, %2, %cst {dimension_numbers = #tpu.dot_dimension_numbers<[1], [0], [0], [1], [0, 0, 1, 1], [], []>} : vector<128x128xf32>, vector<128x128xf32>, vector<128x128xf32> -> vector<128x128xf32>
    %cst_4 = arith.constant dense<0.000000e+00> : vector<128xf32>
    %4 = vector.multi_reduction <add>, %3, %cst_4 [0] : vector<128x128xf32> to vector<128xf32>
    %5 = vector.shape_cast %4 : vector<128xf32> to vector<1x128xf32>
    %cst_5 = arith.constant 7.812500e-03 : f32
    %6 = vector.broadcast %cst_5 : f32 to vector<1x128xf32>
    %7 = arith.mulf %5, %6 : vector<1x128xf32>
    %8 = vector.broadcast %7 : vector<1x128xf32> to vector<128x128xf32>
    %9 = arith.subf %3, %8 : vector<128x128xf32>
    %10 = arith.mulf %9, %9 : vector<128x128xf32>
    %cst_6 = arith.constant dense<0.000000e+00> : vector<128xf32>
    %11 = vector.multi_reduction <add>, %10, %cst_6 [0] : vector<128x128xf32> to vector<128xf32>
    %12 = vector.shape_cast %11 : vector<128xf32> to vector<1x128xf32>
    %13 = tpu.concatenate %5, %12 in 0 : vector<1x128xf32>, vector<1x128xf32> -> vector<2x128xf32>
    %c0_7 = arith.constant 0 : index
    %c0_8 = arith.constant 0 : index
    %c0_9 = arith.constant 0 : index
    %c0_10 = arith.constant 0 : index
    %14 = vector.load %arg5[%c0_7, %c0_8, %c0_9, %c0_10] : memref<1x1x2x128xf32, #tpu.memory_space<vmem>>, vector<1x1x2x128xf32>
    %15 = vector.shape_cast %14 : vector<1x1x2x128xf32> to vector<2x128xf32>
    %16 = vector.shape_cast %13 : vector<2x128xf32> to vector<1x1x2x128xf32>
    tpu.vector_store %arg5[%c0_7, %c0_8, %c0_9, %c0_10], %16 {strides = array<i32>} : memref<1x1x2x128xf32, #tpu.memory_space<vmem>>, vector<1x1x2x128xf32>,
    %17 = vector.extract_strided_slice %3 {offsets = [0, 0], sizes = [128, 8], strides = [1, 1]} : vector<128x128xf32> to vector<128x8xf32>
    %18 = vector.shape_cast %17 : vector<128x8xf32> to vector<8x16x8xf32>
    %c0_11 = arith.constant 0 : index
    %c0_12 = arith.constant 0 : index
    %c0_13 = arith.constant 0 : index
    %c0_14 = arith.constant 0 : index
    %19 = vector.load %arg4[%c0_11, %c0_12, %c0_13, %c0_14] : memref<1x8x16x8xf32, #tpu.memory_space<vmem>>, vector<1x8x16x8xf32>
    %20 = vector.shape_cast %19 : vector<1x8x16x8xf32> to vector<8x16x8xf32>
    %21 = vector.shape_cast %18 : vector<8x16x8xf32> to vector<1x8x16x8xf32>
    tpu.vector_store %arg4[%c0_11, %c0_12, %c0_13, %c0_14], %21 {strides = array<i32>} : memref<1x8x16x8xf32, #tpu.memory_space<vmem>>, vector<1x8x16x8xf32>,
    return
  }
  func.func @transform_0(%arg0: i32, %arg1: i32) -> (i32, i32, i32) {
    %c0_i32 = arith.constant 0 : i32
    %c0_i32_0 = arith.constant 0 : i32
    return %arg0, %arg1, %c0_i32 : i32, i32, i32
  }
  func.func @transform_1(%arg0: i32, %arg1: i32) -> (i32, i32) {
    %c0_i32 = arith.constant 0 : i32
    %c0_i32_0 = arith.constant 0 : i32
    %c0_i32_1 = arith.constant 0 : i32
    return %c0_i32, %c0_i32_0 : i32, i32
  }
  func.func @transform_2(%arg0: i32, %arg1: i32) -> (i32, i32, i32, i32) {
    %c0_i32 = arith.constant 0 : i32
    %c0_i32_0 = arith.constant 0 : i32
    %c0_i32_1 = arith.constant 0 : i32
    return %arg0, %arg1, %c0_i32, %c0_i32_0 : i32, i32, i32, i32
  }
  func.func @transform_3(%arg0: i32, %arg1: i32) -> (i32, i32, i32, i32) {
    %c0_i32 = arith.constant 0 : i32
    %c0_i32_0 = arith.constant 0 : i32
    %c0_i32_1 = arith.constant 0 : i32
    return %arg0, %arg1, %c0_i32, %c0_i32_0 : i32, i32, i32, i32
  }
}

module attributes {stable_mosaic.version = 11 : i64} {
  func.func @conv2_kernel(%arg0: i32, %arg1: i32, %arg2: memref<1x8x16x8xf32, #tpu.memory_space<vmem>>, %arg3: memref<1x1x16x8xf32, #tpu.memory_space<vmem>>, %arg4: memref<1x1x16x8xf32, #tpu.memory_space<vmem>>, %arg5: memref<1x8xf32, #tpu.memory_space<vmem>>, %arg6: memref<1x8xf32, #tpu.memory_space<vmem>>, %arg7: memref<3x24x128xf32, #tpu.memory_space<vmem>>, %arg8: memref<1x8x16x8xf32, #tpu.memory_space<vmem>>, %arg9: memref<1x1x2x128xf32, #tpu.memory_space<vmem>>, %arg10: memref<10x16x8xf32, #tpu.memory_space<vmem>>) attributes {dimension_semantics = [#tpu.dimension_semantics<parallel>, #tpu.dimension_semantics<parallel>], iteration_bounds = array<i64: 2, 2>, scalar_prefetch = 0 : i64, scratch_operands = 1 : i64, tpu.core_type = #tpu.core_type<tc>, window_params = [{transform_indices = @transform_0, window_bounds = array<i64: 1, 8, 16, 8>}, {transform_indices = @transform_1, window_bounds = array<i64: 1, 1, 16, 8>}, {transform_indices = @transform_2, window_bounds = array<i64: 1, 1, 16, 8>}, {pipeline_mode = #tpu.pipeline_mode<synchronous>, transform_indices = @transform_3, window_bounds = array<i64: 1, 8>}, {pipeline_mode = #tpu.pipeline_mode<synchronous>, transform_indices = @transform_4, window_bounds = array<i64: 1, 8>}, {pipeline_mode = #tpu.pipeline_mode<synchronous>, transform_indices = @transform_5, window_bounds = array<i64: 3, 24, 128>}, {transform_indices = @transform_6, window_bounds = array<i64: 1, 8, 16, 8>}, {transform_indices = @transform_7, window_bounds = array<i64: 1, 1, 2, 128>}]} {
    %c0 = arith.constant 0 : index
    %c0_0 = arith.constant 0 : index
    %0 = vector.load %arg5[%c0, %c0_0] : memref<1x8xf32, #tpu.memory_space<vmem>>, vector<1x8xf32>
    %1 = vector.shape_cast %0 : vector<1x8xf32> to vector<1x1x8xf32>
    %c0_1 = arith.constant 0 : index
    %c0_2 = arith.constant 0 : index
    %2 = vector.load %arg6[%c0_1, %c0_2] : memref<1x8xf32, #tpu.memory_space<vmem>>, vector<1x8xf32>
    %3 = vector.shape_cast %2 : vector<1x8xf32> to vector<1x1x8xf32>
    %c0_3 = arith.constant 0 : index
    %c0_4 = arith.constant 0 : index
    %c0_5 = arith.constant 0 : index
    %c0_6 = arith.constant 0 : index
    %4 = vector.load %arg2[%c0_3, %c0_4, %c0_5, %c0_6] : memref<1x8x16x8xf32, #tpu.memory_space<vmem>>, vector<1x8x16x8xf32>
    %5 = vector.shape_cast %4 : vector<1x8x16x8xf32> to vector<8x16x8xf32>
    %6 = vector.broadcast %1 : vector<1x1x8xf32> to vector<8x16x8xf32>
    %7 = arith.mulf %5, %6 : vector<8x16x8xf32>
    %8 = vector.broadcast %3 : vector<1x1x8xf32> to vector<8x16x8xf32>
    %9 = arith.addf %7, %8 : vector<8x16x8xf32>
    %cst = arith.constant 0.000000e+00 : f32
    %10 = vector.broadcast %cst : f32 to vector<8x16x8xf32>
    %11 = arith.maximumf %9, %10 : vector<8x16x8xf32>
    %c1 = arith.constant 1 : index
    %c0_7 = arith.constant 0 : index
    %c0_8 = arith.constant 0 : index
    %12 = vector.load %arg10[%c1, %c0_7, %c0_8] : memref<10x16x8xf32, #tpu.memory_space<vmem>>, vector<8x16x8xf32>
    tpu.vector_store %arg10[%c1, %c0_7, %c0_8], %11 {strides = array<i32>} : memref<10x16x8xf32, #tpu.memory_space<vmem>>, vector<8x16x8xf32>,
    %c0_9 = arith.constant 0 : index
    %c0_10 = arith.constant 0 : index
    %c0_11 = arith.constant 0 : index
    %c0_12 = arith.constant 0 : index
    %13 = vector.load %arg3[%c0_9, %c0_10, %c0_11, %c0_12] : memref<1x1x16x8xf32, #tpu.memory_space<vmem>>, vector<1x1x16x8xf32>
    %14 = vector.shape_cast %13 : vector<1x1x16x8xf32> to vector<1x16x8xf32>
    %15 = vector.broadcast %1 : vector<1x1x8xf32> to vector<1x16x8xf32>
    %16 = arith.mulf %14, %15 : vector<1x16x8xf32>
    %17 = vector.broadcast %3 : vector<1x1x8xf32> to vector<1x16x8xf32>
    %18 = arith.addf %16, %17 : vector<1x16x8xf32>
    %cst_13 = arith.constant 0.000000e+00 : f32
    %19 = vector.broadcast %cst_13 : f32 to vector<1x16x8xf32>
    %20 = arith.maximumf %18, %19 : vector<1x16x8xf32>
    %c0_14 = arith.constant 0 : index
    %c0_15 = arith.constant 0 : index
    %c0_16 = arith.constant 0 : index
    %21 = vector.load %arg10[%c0_14, %c0_15, %c0_16] : memref<10x16x8xf32, #tpu.memory_space<vmem>>, vector<1x16x8xf32>
    tpu.vector_store %arg10[%c0_14, %c0_15, %c0_16], %20 {strides = array<i32>} : memref<10x16x8xf32, #tpu.memory_space<vmem>>, vector<1x16x8xf32>,
    %c0_17 = arith.constant 0 : index
    %c0_18 = arith.constant 0 : index
    %c0_19 = arith.constant 0 : index
    %c0_20 = arith.constant 0 : index
    %22 = vector.load %arg4[%c0_17, %c0_18, %c0_19, %c0_20] : memref<1x1x16x8xf32, #tpu.memory_space<vmem>>, vector<1x1x16x8xf32>
    %23 = vector.shape_cast %22 : vector<1x1x16x8xf32> to vector<1x16x8xf32>
    %24 = vector.broadcast %1 : vector<1x1x8xf32> to vector<1x16x8xf32>
    %25 = arith.mulf %23, %24 : vector<1x16x8xf32>
    %26 = vector.broadcast %3 : vector<1x1x8xf32> to vector<1x16x8xf32>
    %27 = arith.addf %25, %26 : vector<1x16x8xf32>
    %cst_21 = arith.constant 0.000000e+00 : f32
    %28 = vector.broadcast %cst_21 : f32 to vector<1x16x8xf32>
    %29 = arith.maximumf %27, %28 : vector<1x16x8xf32>
    %c9 = arith.constant 9 : index
    %c0_22 = arith.constant 0 : index
    %c0_23 = arith.constant 0 : index
    %30 = vector.load %arg10[%c9, %c0_22, %c0_23] : memref<10x16x8xf32, #tpu.memory_space<vmem>>, vector<1x16x8xf32>
    tpu.vector_store %arg10[%c9, %c0_22, %c0_23], %29 {strides = array<i32>} : memref<10x16x8xf32, #tpu.memory_space<vmem>>, vector<1x16x8xf32>,
    %cst_24 = arith.constant 0.000000e+00 : f32
    %31 = vector.broadcast %cst_24 : f32 to vector<1x16x8xf32>
    %c0_i32 = arith.constant 0 : i32
    %32 = arith.cmpi eq, %arg1, %c0_i32 : i32
    %33 = arith.extui %32 : i1 to i32
    %c0_i32_25 = arith.constant 0 : i32
    %34 = arith.cmpi ne, %33, %c0_i32_25 : i32
    scf.if %34 {
      %c0_60 = arith.constant 0 : index
      %c0_61 = arith.constant 0 : index
      %c0_62 = arith.constant 0 : index
      %91 = vector.load %arg10[%c0_60, %c0_61, %c0_62] : memref<10x16x8xf32, #tpu.memory_space<vmem>>, vector<1x16x8xf32>
      tpu.vector_store %arg10[%c0_60, %c0_61, %c0_62], %31 {strides = array<i32>} : memref<10x16x8xf32, #tpu.memory_space<vmem>>, vector<1x16x8xf32>,
    } else {
    }
    %c1_i32 = arith.constant 1 : i32
    %35 = arith.cmpi eq, %arg1, %c1_i32 : i32
    %36 = arith.extui %35 : i1 to i32
    %c0_i32_26 = arith.constant 0 : i32
    %37 = arith.cmpi ne, %36, %c0_i32_26 : i32
    scf.if %37 {
      %c9_60 = arith.constant 9 : index
      %c0_61 = arith.constant 0 : index
      %c0_62 = arith.constant 0 : index
      %91 = vector.load %arg10[%c9_60, %c0_61, %c0_62] : memref<10x16x8xf32, #tpu.memory_space<vmem>>, vector<1x16x8xf32>
      tpu.vector_store %arg10[%c9_60, %c0_61, %c0_62], %31 {strides = array<i32>} : memref<10x16x8xf32, #tpu.memory_space<vmem>>, vector<1x16x8xf32>,
    } else {
    }
    %cst_27 = arith.constant 0.000000e+00 : f32
    %38 = vector.broadcast %cst_27 : f32 to vector<8x1x8xf32>
    %cst_28 = arith.constant 0.000000e+00 : f32
    %39 = vector.broadcast %cst_28 : f32 to vector<128x128xf32>
    %c0_29 = arith.constant 0 : index
    %c0_30 = arith.constant 0 : index
    %c0_31 = arith.constant 0 : index
    %40 = vector.load %arg10[%c0_29, %c0_30, %c0_31] : memref<10x16x8xf32, #tpu.memory_space<vmem>>, vector<8x16x8xf32>
    %41 = vector.extract_strided_slice %40 {offsets = [0, 0, 0], sizes = [8, 15, 8], strides = [1, 1, 1]} : vector<8x16x8xf32> to vector<8x15x8xf32>
    %42 = tpu.concatenate %38, %41 in 1 : vector<8x1x8xf32>, vector<8x15x8xf32> -> vector<8x16x8xf32>
    %43 = vector.extract_strided_slice %40 {offsets = [0, 1, 0], sizes = [8, 15, 8], strides = [1, 1, 1]} : vector<8x16x8xf32> to vector<8x15x8xf32>
    %44 = tpu.concatenate %43, %38 in 1 : vector<8x15x8xf32>, vector<8x1x8xf32> -> vector<8x16x8xf32>
    %45 = tpu.concatenate %42, %40, %44 in 2 : vector<8x16x8xf32>, vector<8x16x8xf32>, vector<8x16x8xf32> -> vector<8x16x24xf32>
    %46 = vector.shape_cast %45 : vector<8x16x24xf32> to vector<128x24xf32>
    %c0_32 = arith.constant 0 : index
    %c0_33 = arith.constant 0 : index
    %c0_34 = arith.constant 0 : index
    %47 = vector.load %arg7[%c0_32, %c0_33, %c0_34] : memref<3x24x128xf32, #tpu.memory_space<vmem>>, vector<1x24x128xf32>
    %48 = vector.shape_cast %47 : vector<1x24x128xf32> to vector<24x128xf32>
    %cst_35 = arith.constant dense<0.000000e+00> : vector<128x128xf32>
    %49 = tpu.matmul %46, %48, %cst_35 {dimension_numbers = #tpu.dot_dimension_numbers<[1], [0], [0], [1], [0, 0, 1, 1], [], []>} : vector<128x24xf32>, vector<24x128xf32>, vector<128x128xf32> -> vector<128x128xf32>
    %50 = arith.addf %39, %49 : vector<128x128xf32>
    %c1_36 = arith.constant 1 : index
    %c0_37 = arith.constant 0 : index
    %c0_38 = arith.constant 0 : index
    %51 = vector.load %arg10[%c1_36, %c0_37, %c0_38] : memref<10x16x8xf32, #tpu.memory_space<vmem>>, vector<8x16x8xf32>
    %52 = vector.extract_strided_slice %51 {offsets = [0, 0, 0], sizes = [8, 15, 8], strides = [1, 1, 1]} : vector<8x16x8xf32> to vector<8x15x8xf32>
    %53 = tpu.concatenate %38, %52 in 1 : vector<8x1x8xf32>, vector<8x15x8xf32> -> vector<8x16x8xf32>
    %54 = vector.extract_strided_slice %51 {offsets = [0, 1, 0], sizes = [8, 15, 8], strides = [1, 1, 1]} : vector<8x16x8xf32> to vector<8x15x8xf32>
    %55 = tpu.concatenate %54, %38 in 1 : vector<8x15x8xf32>, vector<8x1x8xf32> -> vector<8x16x8xf32>
    %56 = tpu.concatenate %53, %51, %55 in 2 : vector<8x16x8xf32>, vector<8x16x8xf32>, vector<8x16x8xf32> -> vector<8x16x24xf32>
    %57 = vector.shape_cast %56 : vector<8x16x24xf32> to vector<128x24xf32>
    %c1_39 = arith.constant 1 : index
    %c0_40 = arith.constant 0 : index
    %c0_41 = arith.constant 0 : index
    %58 = vector.load %arg7[%c1_39, %c0_40, %c0_41] : memref<3x24x128xf32, #tpu.memory_space<vmem>>, vector<1x24x128xf32>
    %59 = vector.shape_cast %58 : vector<1x24x128xf32> to vector<24x128xf32>
    %cst_42 = arith.constant dense<0.000000e+00> : vector<128x128xf32>
    %60 = tpu.matmul %57, %59, %cst_42 {dimension_numbers = #tpu.dot_dimension_numbers<[1], [0], [0], [1], [0, 0, 1, 1], [], []>} : vector<128x24xf32>, vector<24x128xf32>, vector<128x128xf32> -> vector<128x128xf32>
    %61 = arith.addf %50, %60 : vector<128x128xf32>
    %c2 = arith.constant 2 : index
    %c0_43 = arith.constant 0 : index
    %c0_44 = arith.constant 0 : index
    %62 = vector.load %arg10[%c2, %c0_43, %c0_44] : memref<10x16x8xf32, #tpu.memory_space<vmem>>, vector<8x16x8xf32>
    %63 = vector.extract_strided_slice %62 {offsets = [0, 0, 0], sizes = [8, 15, 8], strides = [1, 1, 1]} : vector<8x16x8xf32> to vector<8x15x8xf32>
    %64 = tpu.concatenate %38, %63 in 1 : vector<8x1x8xf32>, vector<8x15x8xf32> -> vector<8x16x8xf32>
    %65 = vector.extract_strided_slice %62 {offsets = [0, 1, 0], sizes = [8, 15, 8], strides = [1, 1, 1]} : vector<8x16x8xf32> to vector<8x15x8xf32>
    %66 = tpu.concatenate %65, %38 in 1 : vector<8x15x8xf32>, vector<8x1x8xf32> -> vector<8x16x8xf32>
    %67 = tpu.concatenate %64, %62, %66 in 2 : vector<8x16x8xf32>, vector<8x16x8xf32>, vector<8x16x8xf32> -> vector<8x16x24xf32>
    %68 = vector.shape_cast %67 : vector<8x16x24xf32> to vector<128x24xf32>
    %c2_45 = arith.constant 2 : index
    %c0_46 = arith.constant 0 : index
    %c0_47 = arith.constant 0 : index
    %69 = vector.load %arg7[%c2_45, %c0_46, %c0_47] : memref<3x24x128xf32, #tpu.memory_space<vmem>>, vector<1x24x128xf32>
    %70 = vector.shape_cast %69 : vector<1x24x128xf32> to vector<24x128xf32>
    %cst_48 = arith.constant dense<0.000000e+00> : vector<128x128xf32>
    %71 = tpu.matmul %68, %70, %cst_48 {dimension_numbers = #tpu.dot_dimension_numbers<[1], [0], [0], [1], [0, 0, 1, 1], [], []>} : vector<128x24xf32>, vector<24x128xf32>, vector<128x128xf32> -> vector<128x128xf32>
    %72 = arith.addf %61, %71 : vector<128x128xf32>
    %cst_49 = arith.constant dense<0.000000e+00> : vector<128xf32>
    %73 = vector.multi_reduction <add>, %72, %cst_49 [0] : vector<128x128xf32> to vector<128xf32>
    %74 = vector.shape_cast %73 : vector<128xf32> to vector<1x128xf32>
    %cst_50 = arith.constant 7.812500e-03 : f32
    %75 = vector.broadcast %cst_50 : f32 to vector<1x128xf32>
    %76 = arith.mulf %74, %75 : vector<1x128xf32>
    %77 = vector.broadcast %76 : vector<1x128xf32> to vector<128x128xf32>
    %78 = arith.subf %72, %77 : vector<128x128xf32>
    %79 = arith.mulf %78, %78 : vector<128x128xf32>
    %cst_51 = arith.constant dense<0.000000e+00> : vector<128xf32>
    %80 = vector.multi_reduction <add>, %79, %cst_51 [0] : vector<128x128xf32> to vector<128xf32>
    %81 = vector.shape_cast %80 : vector<128xf32> to vector<1x128xf32>
    %82 = tpu.concatenate %74, %81 in 0 : vector<1x128xf32>, vector<1x128xf32> -> vector<2x128xf32>
    %c0_52 = arith.constant 0 : index
    %c0_53 = arith.constant 0 : index
    %c0_54 = arith.constant 0 : index
    %c0_55 = arith.constant 0 : index
    %83 = vector.load %arg9[%c0_52, %c0_53, %c0_54, %c0_55] : memref<1x1x2x128xf32, #tpu.memory_space<vmem>>, vector<1x1x2x128xf32>
    %84 = vector.shape_cast %83 : vector<1x1x2x128xf32> to vector<2x128xf32>
    %85 = vector.shape_cast %82 : vector<2x128xf32> to vector<1x1x2x128xf32>
    tpu.vector_store %arg9[%c0_52, %c0_53, %c0_54, %c0_55], %85 {strides = array<i32>} : memref<1x1x2x128xf32, #tpu.memory_space<vmem>>, vector<1x1x2x128xf32>,
    %86 = vector.extract_strided_slice %72 {offsets = [0, 0], sizes = [128, 8], strides = [1, 1]} : vector<128x128xf32> to vector<128x8xf32>
    %87 = vector.shape_cast %86 : vector<128x8xf32> to vector<8x16x8xf32>
    %c0_56 = arith.constant 0 : index
    %c0_57 = arith.constant 0 : index
    %c0_58 = arith.constant 0 : index
    %c0_59 = arith.constant 0 : index
    %88 = vector.load %arg8[%c0_56, %c0_57, %c0_58, %c0_59] : memref<1x8x16x8xf32, #tpu.memory_space<vmem>>, vector<1x8x16x8xf32>
    %89 = vector.shape_cast %88 : vector<1x8x16x8xf32> to vector<8x16x8xf32>
    %90 = vector.shape_cast %87 : vector<8x16x8xf32> to vector<1x8x16x8xf32>
    tpu.vector_store %arg8[%c0_56, %c0_57, %c0_58, %c0_59], %90 {strides = array<i32>} : memref<1x8x16x8xf32, #tpu.memory_space<vmem>>, vector<1x8x16x8xf32>,
    return
  }
  func.func @transform_0(%arg0: i32, %arg1: i32) -> (i32, i32, i32, i32) {
    %c0_i32 = arith.constant 0 : i32
    %c0_i32_0 = arith.constant 0 : i32
    %c0_i32_1 = arith.constant 0 : i32
    return %arg0, %arg1, %c0_i32, %c0_i32_0 : i32, i32, i32, i32
  }
  func.func @transform_1(%arg0: i32, %arg1: i32) -> (i32, i32, i32, i32) {
    %c8_i32 = arith.constant 8 : i32
    %0 = arith.muli %arg1, %c8_i32 : i32
    %c1_i32 = arith.constant 1 : i32
    %1 = arith.subi %0, %c1_i32 : i32
    %c0_i32 = arith.constant 0 : i32
    %2 = arith.maxsi %1, %c0_i32 : i32
    %c0_i32_0 = arith.constant 0 : i32
    %c0_i32_1 = arith.constant 0 : i32
    %c0_i32_2 = arith.constant 0 : i32
    return %arg0, %2, %c0_i32_0, %c0_i32_1 : i32, i32, i32, i32
  }
  func.func @transform_2(%arg0: i32, %arg1: i32) -> (i32, i32, i32, i32) {
    %c1_i32 = arith.constant 1 : i32
    %0 = arith.addi %arg1, %c1_i32 : i32
    %c8_i32 = arith.constant 8 : i32
    %1 = arith.muli %0, %c8_i32 : i32
    %c15_i32 = arith.constant 15 : i32
    %2 = arith.minsi %1, %c15_i32 : i32
    %c0_i32 = arith.constant 0 : i32
    %c0_i32_0 = arith.constant 0 : i32
    %c0_i32_1 = arith.constant 0 : i32
    return %arg0, %2, %c0_i32, %c0_i32_0 : i32, i32, i32, i32
  }
  func.func @transform_3(%arg0: i32, %arg1: i32) -> (i32, i32) {
    %c0_i32 = arith.constant 0 : i32
    %c0_i32_0 = arith.constant 0 : i32
    %c0_i32_1 = arith.constant 0 : i32
    return %c0_i32, %c0_i32_0 : i32, i32
  }
  func.func @transform_4(%arg0: i32, %arg1: i32) -> (i32, i32) {
    %c0_i32 = arith.constant 0 : i32
    %c0_i32_0 = arith.constant 0 : i32
    %c0_i32_1 = arith.constant 0 : i32
    return %c0_i32, %c0_i32_0 : i32, i32
  }
  func.func @transform_5(%arg0: i32, %arg1: i32) -> (i32, i32, i32) {
    %c0_i32 = arith.constant 0 : i32
    %c0_i32_0 = arith.constant 0 : i32
    %c0_i32_1 = arith.constant 0 : i32
    %c0_i32_2 = arith.constant 0 : i32
    return %c0_i32, %c0_i32_0, %c0_i32_1 : i32, i32, i32
  }
  func.func @transform_6(%arg0: i32, %arg1: i32) -> (i32, i32, i32, i32) {
    %c0_i32 = arith.constant 0 : i32
    %c0_i32_0 = arith.constant 0 : i32
    %c0_i32_1 = arith.constant 0 : i32
    return %arg0, %arg1, %c0_i32, %c0_i32_0 : i32, i32, i32, i32
  }
  func.func @transform_7(%arg0: i32, %arg1: i32) -> (i32, i32, i32, i32) {
    %c0_i32 = arith.constant 0 : i32
    %c0_i32_0 = arith.constant 0 : i32
    %c0_i32_1 = arith.constant 0 : i32
    return %arg0, %arg1, %c0_i32, %c0_i32_0 : i32, i32, i32, i32
  }
}

</mosaic_0001>

<bundles_post_ra>
// kernel: double_conv.2
= control target key start
LH: loop header
LB: loop body
LE: loop exit
PB: predicated region body
PF: predicated region fallthrough
CT: control target
= control target key end

     0   :  { %s732_s12 = smov 0   ;;  %s734_s13 = smov 0   ;;  %s928_s0 = inlined_call_operand.vmem [shape: f32[2,256,128], index: 0, kind: input, shape index: {}]   ;;  %s929_s1 = inlined_call_operand.vmem [shape: f32[128,128], index: 1, kind: input, shape index: {}]   ;;  %s930_s2 = inlined_call_operand.vmem [shape: f32[2,16,16,8], index: 2, kind: output, shape index: {0}]   ;;  %s931_s3 = inlined_call_operand.vmem [shape: f32[2,2,2,128], index: 3, kind: output, shape index: {1}]  }
   0x1   :  { %s736_s14 = smov 0   ;;  %s738_s15 = smov 0  }
   0x2   :  { %s740_s16 = smov 0  }
   0x3 LB: > { %s23_s17 = sadd.s32 1, %s702_s14  ;;  %s26_s18 = sadd.s32 1, %s706_s15  ;;  %s710_s16 = sphi %s740_s16, %s14_s16   ;;  %s706_s15 = sphi %s738_s15, %s935_s15   ;;  %s702_s14 = sphi %s736_s14, %s934_s14   ;;  %s698_s13 = sphi %s734_s13, %s933_s13   ;;  %s694_s12 = sphi %s732_s12, %s932_s12  }
   0x4   : > { %p24_p0 = scmp.ge.s32.totalorder %s23_s17, 2  ;;  %p572_p1 = scmp.ge.s32.totalorder %s710_s16, 1 }
   0x5   : > { %p163_p2 = scmp.lt.s32.totalorder %s710_s16, 5 }
   0x6   : > { %s937_s17 = smov (%p24_p0, %s23_s17), 0  ;;  %s939_s18 = smov (!%p24_p0, %s26_s18), %s706_s15 }
   0x7   : > { %p164_p3 = pnand %p572_p1, %p163_p2  ;;  %p28_p4 = scmp.ge.s32.totalorder %s939_s18, 2 }
   0x8   : > { %s573_s4 = sshll.u32 (!%p164_p3), %s694_s12, 4  ;;  %p205_p5 = scmp.lt.s32.totalorder (!%p164_p3), %s698_s13, 1 }
   0x9   : > { %s941_s18 = smov (%p28_p4, %s939_s18), 0  ;;  %167 = sbr.rel (%p164_p3) target bundleno = 284 (0x11c), region = 28 }
   0xa   : > { %p207_p6 = scmp.lt.s32.totalorder (!%p164_p3), %s573_s4, 31  ;;  %s576_s11 = sshll.u32 (!%p164_p3), %s694_s12, 3 }
   0xb   : > { %p217_p7 = scmp.lt.s32.totalorder (!%p164_p3), %s576_s11, 15  ;;  %p227_p8 = scmp.lt.s32.totalorder (!%p164_p3), %s694_s12, 1 }
   0xe   : > { %v264_v0 = vld [vmem:[%s929_s1 + $0x78] sm:$0xff]  ;;  %v263_v1 = vld [vmem:[%s929_s1 + $0x70] sm:$0xff]  ;;  %v262_v2 = vld [vmem:[%s929_s1 + $0x68] sm:$0xff]  ;;  %s943_s13 = smov (!%p205_p5, %s698_s13), 1  ;;  %s945_s4 = smov (!%p207_p6, %s573_s4), 31  ;;  %vm408_vm0 = vcmask 64512  }
   0xf   : > { %265 = vmatpush.msra.mxu0 %v264_v0  ;;  %584 = vmatpush.msra.mxu1 %v264_v0  ;;  %v261_v3 = vld [vmem:[%s929_s1 + $0x60] sm:$0xff]  ;;  %v260_v4 = vld [vmem:[%s929_s1 + $0x58] sm:$0xff]  ;;  %v259_v5 = vld [vmem:[%s929_s1 + $0x50] sm:$0xff]  ;;  %s574_s20 = sshll.u32 %s943_s13, 5  ;;  %s947_s11 = smov (!%p217_p7, %s576_s11), 15  ;;  %vm405_vm1 = vcmask 1040384  }
  0x10   : > { %585 = vmatpush.msra.mxu2 %v264_v0  ;;  %586 = vmatpush.msra.mxu3 %v264_v0  ;;  %v258_v6 = vld [vmem:[%s929_s1 + $0x48] sm:$0xff]  ;;  %v257_v7 = vld [vmem:[%s929_s1 + $0x40] sm:$0xff]  ;;  %v256_v8 = vld [vmem:[%s929_s1 + $0x38] sm:$0xff]  ;;  %s210_s25 = sadd.s32 %s574_s20, %s945_s4  ;;  %s577_s19 = sshll.u32 %s947_s11, 1 }
  0x11   : > { %266 = vmatpush.msra.mxu0 %v263_v1  ;;  %587 = vmatpush.msra.mxu1 %v263_v1  ;;  %v255_v9 = vld [vmem:[%s929_s1 + $0x30] sm:$0xff]  ;;  %v254_v10 = vld [vmem:[%s929_s1 + $0x28] sm:$0xff]  ;;  %v253_v11 = vld [vmem:[%s929_s1 + $0x20] sm:$0xff]  ;;  %s575_s28 = sshll.u32 %s210_s25, 3  ;;  %s221_s21 = sadd.s32 %s577_s19, %s574_s20 }
  0x12   : > { %588 = vmatpush.msra.mxu2 %v263_v1  ;;  %589 = vmatpush.msra.mxu3 %v263_v1  ;;  %v252_v12 = vld [vmem:[%s929_s1 + $0x18] sm:$0xff]  ;;  %v251_v13 = vld [vmem:[%s929_s1 + $0x10] sm:$0xff]  ;;  %v250_v14 = vld [vmem:[%s929_s1 + $0x8] sm:$0xff]  ;;  %s822_s8 = scalar_lea.vmem %s928_s0, %s575_s28  ;;  %s579_s22 = sshll.u32 %s221_s21, 3 }
  0x13   : > { %267 = vmatpush.msra.mxu0 %v262_v2  ;;  %590 = vmatpush.msra.mxu1 %v262_v2  ;;  %v249_v15 = vld [vmem:[%s929_s1] sm:$0xff]  ;;  %v234_v20 = vld [vmem:[%s822_s8 + $0x8] sm:$0xff]  ;;  %v235_v24 = vld [vmem:[%s822_s8 + $0x10] sm:$0xff]  ;;  %s849_s25 = scalar_lea.vmem %s930_s2, %s579_s22  ;;  %s949_s12 = smov (!%p227_p8, %s694_s12), 1 }
  0x14   : > { %591 = vmatpush.msra.mxu2 %v262_v2  ;;  %592 = vmatpush.msra.mxu3 %v262_v2  ;;  %v233_v16 = vld [vmem:[%s822_s8] sm:$0xff]  ;;  %v238_v21 = vld [vmem:[%s822_s8 + $0x28] sm:$0xff]  ;;  %v239_v25 = vld [vmem:[%s822_s8 + $0x30] sm:$0xff]  ;;  %s580_s20 = sshll.u32 %s943_s13, 1 }
  0x15   : > { %268 = vmatpush.msra.mxu0 %v261_v3  ;;  %593 = vmatpush.msra.mxu1 %v261_v3  ;;  %v237_v17 = vld [vmem:[%s822_s8 + $0x20] sm:$0xff]  ;;  %v242_v22 = vld [vmem:[%s822_s8 + $0x48] sm:$0xff]  ;;  %v243_v26 = vld [vmem:[%s822_s8 + $0x50] sm:$0xff]  ;;  %s230_s26 = sadd.s32 %s580_s20, %s949_s12 }
  0x16   : > { %594 = vmatpush.msra.mxu2 %v261_v3  ;;  %595 = vmatpush.msra.mxu3 %v261_v3  ;;  %v241_v18 = vld [vmem:[%s822_s8 + $0x40] sm:$0xff]  ;;  %v246_v23 = vld [vmem:[%s822_s8 + $0x68] sm:$0xff]  ;;  %v247_v27 = vld [vmem:[%s822_s8 + $0x70] sm:$0xff]  ;;  %s581_s27 = sshll.u32 %s230_s26, 1 }
  0x17   : > { %269 = vmatpush.msra.mxu0 %v260_v4  ;;  %596 = vmatpush.msra.mxu1 %v260_v4  ;;  %v245_v19 = vld [vmem:[%s822_s8 + $0x60] sm:$0xff]  ;;  %v236_v28 = vld [vmem:[%s822_s8 + $0x18] sm:$0xff]  ;;  %s232_s30 = scalar_lea.vmem %s931_s3, %s581_s27 }
  0x18   : > { %597 = vmatpush.msra.mxu2 %v260_v4  ;;  %598 = vmatpush.msra.mxu3 %v260_v4  ;;  %v240_v29 = vld [vmem:[%s822_s8 + $0x38] sm:$0xff] }
  0x19   : > { %270 = vmatpush.msra.mxu0 %v259_v5  ;;  %599 = vmatpush.msra.mxu1 %v259_v5  ;;  %v244_v30 = vld [vmem:[%s822_s8 + $0x58] sm:$0xff] }
  0x1a   : > { %600 = vmatpush.msra.mxu2 %v259_v5  ;;  %601 = vmatpush.msra.mxu3 %v259_v5  ;;  %v248_v31 = vld [vmem:[%s822_s8 + $0x78] sm:$0xff] }
  0x1b   : > { %271 = vmatpush.msra.mxu0 %v258_v6  ;;  %602 = vmatpush.msra.mxu1 %v258_v6 }
  0x1c   : > { %603 = vmatpush.msra.mxu2 %v258_v6  ;;  %604 = vmatpush.msra.mxu3 %v258_v6 }
  0x1d   : > { %272 = vmatpush.msra.mxu0 %v257_v7  ;;  %605 = vmatpush.msra.mxu1 %v257_v7 }
  0x1e   : > { %606 = vmatpush.msra.mxu2 %v257_v7  ;;  %607 = vmatpush.msra.mxu3 %v257_v7 }
  0x1f   : > { %273 = vmatpush.msra.mxu0 %v256_v8  ;;  %608 = vmatpush.msra.mxu1 %v256_v8 }
  0x20   : > { %609 = vmatpush.msra.mxu2 %v256_v8  ;;  %610 = vmatpush.msra.mxu3 %v256_v8 }
  0x21   : > { %274 = vmatpush.msra.mxu0 %v255_v9  ;;  %611 = vmatpush.msra.mxu1 %v255_v9 }
  0x22   : > { %612 = vmatpush.msra.mxu2 %v255_v9  ;;  %613 = vmatpush.msra.mxu3 %v255_v9 }
  0x23   : > { %275 = vmatpush.msra.mxu0 %v254_v10  ;;  %614 = vmatpush.msra.mxu1 %v254_v10 }
  0x24   : > { %615 = vmatpush.msra.mxu2 %v254_v10  ;;  %616 = vmatpush.msra.mxu3 %v254_v10 }
  0x25   : > { %276 = vmatpush.msra.mxu0 %v253_v11  ;;  %617 = vmatpush.msra.mxu1 %v253_v11 }
  0x26   : > { %618 = vmatpush.msra.mxu2 %v253_v11  ;;  %619 = vmatpush.msra.mxu3 %v253_v11 }
  0x27   : > { %277 = vmatpush.msra.mxu0 %v252_v12  ;;  %620 = vmatpush.msra.mxu1 %v252_v12 }
  0x28   : > { %621 = vmatpush.msra.mxu2 %v252_v12  ;;  %622 = vmatpush.msra.mxu3 %v252_v12 }
  0x29   : > { %278 = vmatpush.msra.mxu0 %v251_v13  ;;  %623 = vmatpush.msra.mxu1 %v251_v13 }
  0x2a   : > { %624 = vmatpush.msra.mxu2 %v251_v13  ;;  %625 = vmatpush.msra.mxu3 %v251_v13 }
  0x2b   : > { %279 = vmatpush.msra.mxu0 %v250_v14  ;;  %626 = vmatpush.msra.mxu1 %v250_v14 }
  0x2c   : > { %627 = vmatpush.msra.mxu2 %v250_v14  ;;  %628 = vmatpush.msra.mxu3 %v250_v14 }
  0x2d   : > { %280 = vmatpush.msra.mxu0 %v249_v15  ;;  %629 = vmatpush.msra.mxu1 %v249_v15 }
  0x2e   : > { %281 = vmatmul.f32.vlgmr.msra.gmra.mxu0 %v233_v16  ;;  %293 = vmatmul.f32.vlgmr.msra.gmra.mxu1 %v237_v17 }
  0x2f   : > { %630 = vmatpush.msra.mxu2 %v249_v15  ;;  %631 = vmatpush.msra.mxu3 %v249_v15 }
  0x30   : > { %305 = vmatmul.f32.vlgmr.msra.gmra.mxu2 %v241_v18  ;;  %317 = vmatmul.f32.vlgmr.msra.gmra.mxu3 %v245_v19 }
  0x36   : > { %284 = vmatmul.f32.gmra.mxu0 %v234_v20  ;;  %296 = vmatmul.f32.gmra.mxu1 %v238_v21 }
  0x38   : > { %308 = vmatmul.f32.gmra.mxu2 %v242_v22  ;;  %320 = vmatmul.f32.gmra.mxu3 %v246_v23 }
  0x3e   : > { %287 = vmatmul.f32.gmra.mxu0 %v235_v24  ;;  %299 = vmatmul.f32.gmra.mxu1 %v239_v25 }
  0x40   : > { %311 = vmatmul.f32.gmra.mxu2 %v243_v26  ;;  %323 = vmatmul.f32.gmra.mxu3 %v247_v27 }
  0x46   : > { %290 = vmatmul.f32.gmra.mxu0 %v236_v28  ;;  %302 = vmatmul.f32.gmra.mxu1 %v240_v29 }
  0x48   : > { %314 = vmatmul.f32.gmra.mxu2 %v244_v30  ;;  %326 = vmatmul.f32.gmra.mxu3 %v248_v31 }
  0xab   : > { %v282_v32 = vpop.f32.mrf.mxu0  ;;  %v294_v33 = vpop.f32.mrf.mxu1 }
  0xac   : > { %409 = vst.msk [vmem:[%s849_s25] sm:$0xff] %vm408_vm0, %v282_v32 }
  0xad   : > { %413 = vst.msk [vmem:[%s849_s25 + $0x20] sm:$0xff] %vm408_vm0, %v294_v33 }
  0xb3   : > { %v285_v34 = vpop.f32.mrf.mxu0  ;;  %v297_v35 = vpop.f32.mrf.mxu1 }
  0xb4   : > { %410 = vst.msk [vmem:[%s849_s25 + $0x8] sm:$0xff] %vm408_vm0, %v285_v34  ;;  %v857_v36 = vpop.f32.mrf.mxu2  ;;  %v859_v37 = vpop.f32.mrf.mxu3  ;;  %v330_v42 = vadd.f32 %v285_v34, %v282_v32 }
  0xb5   : > { %414 = vst.msk [vmem:[%s849_s25 + $0x28] sm:$0xff] %vm408_vm0, %v297_v35 }
  0xb6   : > { %417 = vst.msk [vmem:[%s849_s25 + $0x40] sm:$0xff] %vm408_vm0, %v857_v36 }
  0xb7   : > { %421 = vst.msk [vmem:[%s849_s25 + $0x60] sm:$0xff] %vm408_vm0, %v859_v37 }
  0xbb   : > { %v288_v38 = vpop.f32.mrf.mxu0  ;;  %v300_v39 = vpop.f32.mrf.mxu1 }
  0xbc   : > { %411 = vst.msk [vmem:[%s849_s25 + $0x10] sm:$0xff] %vm408_vm0, %v288_v38  ;;  %v309_v40 = vpop.f32.mrf.mxu2  ;;  %v871_v41 = vpop.f32.mrf.mxu3  ;;  %v331_v43 = vadd.f32 %v330_v42, %v288_v38 }
  0xbd   : > { %415 = vst.msk [vmem:[%s849_s25 + $0x30] sm:$0xff] %vm408_vm0, %v300_v39 }
  0xbe   : > { %418 = vst.msk [vmem:[%s849_s25 + $0x48] sm:$0xff] %vm408_vm0, %v309_v40 }
  0xbf   : > { %422 = vst.msk [vmem:[%s849_s25 + $0x68] sm:$0xff] %vm408_vm0, %v871_v41 }
  0xc3   : > { %v291_v44 = vpop.f32.mrf.mxu0  ;;  %v303_v45 = vpop.f32.mrf.mxu1 }
  0xc4   : > { %v332_v46 = vadd.f32 %v331_v43, %v291_v44  ;;  %412 = vst.msk [vmem:[%s849_s25 + $0x18] sm:$0xff] %vm408_vm0, %v291_v44  ;;  %v312_v47 = vpop.f32.mrf.mxu2  ;;  %v882_v48 = vpop.f32.mrf.mxu3 }
  0xc5   : > { %416 = vst.msk [vmem:[%s849_s25 + $0x38] sm:$0xff] %vm408_vm0, %v303_v45 }
  0xc6   : > { %v333_v49 = vadd.f32 %v332_v46, %v294_v33  ;;  %419 = vst.msk [vmem:[%s849_s25 + $0x50] sm:$0xff] %vm408_vm0, %v312_v47 }
  0xc7   : > { %423 = vst.msk [vmem:[%s849_s25 + $0x70] sm:$0xff] %vm408_vm0, %v882_v48 }
  0xc8   : > { %v334_v50 = vadd.f32 %v333_v49, %v297_v35 }
  0xca   : > { %v335_v51 = vadd.f32 %v334_v50, %v300_v39 }
  0xcc   : > { %v336_v52 = vadd.f32 %v335_v51, %v303_v45  ;;  %v315_v53 = vpop.f32.mrf.mxu2  ;;  %v327_v54 = vpop.f32.mrf.mxu3 }
  0xcd   : > { %420 = vst.msk [vmem:[%s849_s25 + $0x58] sm:$0xff] %vm408_vm0, %v315_v53 }
  0xce   : > { %v337_v55 = vadd.f32 %v336_v52, %v857_v36  ;;  %424 = vst.msk [vmem:[%s849_s25 + $0x78] sm:$0xff] %vm408_vm0, %v327_v54 }
  0xd0   : > { %v338_v56 = vadd.f32 %v337_v55, %v309_v40 }
  0xd2   : > { %v339_v57 = vadd.f32 %v338_v56, %v312_v47 }
  0xd4   : > { %v340_v58 = vadd.f32 %v339_v57, %v315_v53 }
  0xd6   : > { %v341_v59 = vadd.f32 %v340_v58, %v859_v37 }
  0xd8   : > { %v342_v60 = vadd.f32 %v341_v59, %v871_v41 }
  0xda   : > { %v343_v61 = vadd.f32 %v342_v60, %v882_v48 }
  0xdc   : > { %v344_v62 = vadd.f32 %v343_v61, %v327_v54 }
  0xde   : > { %v345_v63 = vrot.slane %v344_v62, 4 }
  0xe0   : > { %v346_v0 = vadd.f32 %v345_v63, %v344_v62 }
  0xe2   : > { %v347_v1 = vrot.slane %v346_v0, 2 }
  0xe4   : > { %v348_v2 = vadd.f32 %v347_v1, %v346_v0 }
  0xe6   : > { %v349_v3 = vrot.slane %v348_v2, 1 }
  0xe8   : > { %v899_v4 = vadd.f32 %v349_v3, %v348_v2 }
  0xea   : > { %v351_v5 = vmul.f32 0.0078125, %v899_v4 }
  0xec   : > { %v352_v6 = vsub.f32 %v282_v32, %v351_v5  ;;  %v353_v7 = vsub.f32 %v285_v34, %v351_v5  ;;  %v354_v8 = vsub.f32 %v288_v38, %v351_v5  ;;  %v355_v11 = vsub.f32 %v291_v44, %v351_v5 }
  0xed   : > { %v356_v12 = vsub.f32 %v294_v33, %v351_v5  ;;  %v357_v15 = vsub.f32 %v297_v35, %v351_v5  ;;  %v358_v18 = vsub.f32 %v300_v39, %v351_v5  ;;  %v359_v21 = vsub.f32 %v303_v45, %v351_v5 }
  0xee   : > { %v368_v9 = vmul.f32 %v352_v6, %v352_v6  ;;  %v369_v10 = vmul.f32 %v353_v7, %v353_v7  ;;  %v370_v13 = vmul.f32 %v354_v8, %v354_v8  ;;  %v371_v16 = vmul.f32 %v355_v11, %v355_v11 }
  0xef   : > { %v372_v19 = vmul.f32 %v356_v12, %v356_v12  ;;  %v373_v22 = vmul.f32 %v357_v15, %v357_v15  ;;  %v360_v24 = vsub.f32 %v857_v36, %v351_v5  ;;  %v374_v25 = vmul.f32 %v358_v18, %v358_v18 }
  0xf0   : > { %v384_v14 = vadd.f32 %v369_v10, %v368_v9  ;;  %v361_v27 = vsub.f32 %v309_v40, %v351_v5  ;;  %v375_v28 = vmul.f32 %v359_v21, %v359_v21  ;;  %v362_v30 = vsub.f32 %v312_v47, %v351_v5 }
  0xf1   : > { %v376_v31 = vmul.f32 %v360_v24, %v360_v24  ;;  %v363_v33 = vsub.f32 %v315_v53, %v351_v5  ;;  %v364_v38 = vsub.f32 %v859_v37, %v351_v5  ;;  %v365_v43 = vsub.f32 %v871_v41, %v351_v5 }
  0xf2   : > { %v385_v17 = vadd.f32 %v384_v14, %v370_v13  ;;  %v377_v34 = vmul.f32 %v361_v27, %v361_v27  ;;  %v378_v39 = vmul.f32 %v362_v30, %v362_v30  ;;  %v366_v40 = vsub.f32 %v882_v48, %v351_v5 }
  0xf3   : > { %v379_v36 = vmul.f32 %v363_v33, %v363_v33  ;;  %v380_v45 = vmul.f32 %v364_v38, %v364_v38  ;;  %v367_v47 = vsub.f32 %v327_v54, %v351_v5  ;;  %v381_v49 = vmul.f32 %v365_v43, %v365_v43 }
  0xf4   : > { %v386_v20 = vadd.f32 %v385_v17, %v371_v16  ;;  %v382_v51 = vmul.f32 %v366_v40, %v366_v40 }
  0xf5   : > { %v383_v53 = vmul.f32 %v367_v47, %v367_v47 }
  0xf6   : > { %v387_v23 = vadd.f32 %v386_v20, %v372_v19 }
  0xf8   : > { %v388_v26 = vadd.f32 %v387_v23, %v373_v22 }
  0xfa   : > { %v389_v29 = vadd.f32 %v388_v26, %v374_v25 }
  0xfc   : > { %v390_v32 = vadd.f32 %v389_v29, %v375_v28 }
  0xfe   : > { %v391_v35 = vadd.f32 %v390_v32, %v376_v31 }
 0x100   : > { %v392_v42 = vadd.f32 %v391_v35, %v377_v34 }
 0x102   : > { %v393_v44 = vadd.f32 %v392_v42, %v378_v39 }
 0x104   : > { %v394_v46 = vadd.f32 %v393_v44, %v379_v36 }
 0x106   : > { %v395_v50 = vadd.f32 %v394_v46, %v380_v45 }
 0x108   : > { %v396_v52 = vadd.f32 %v395_v50, %v381_v49 }
 0x10a   : > { %v397_v37 = vadd.f32 %v396_v52, %v382_v51 }
 0x10c   : > { %v398_v55 = vadd.f32 %v397_v37, %v383_v53 }
 0x10e   : > { %v399_v56 = vrot.slane %v398_v55, 4 }
 0x110   : > { %v400_v41 = vadd.f32 %v399_v56, %v398_v55 }
 0x112   : > { %v401_v57 = vrot.slane %v400_v41, 2 }
 0x114   : > { %v402_v58 = vadd.f32 %v401_v57, %v400_v41 }
 0x116   : > { %v403_v48 = vrot.slane %v402_v58, 1 }
 0x118   : > { %v404_v54 = vadd.f32 %v403_v48, %v402_v58 }
 0x11a   : > { %v406_v59 = vsel %vm405_vm1, %v899_v4, %v404_v54 }
 0x11b   : > { %407 = vst [vmem:[%s232_s30] sm:$0x3] %v406_v59 }
 0x11c PF: > { %s14_s16 = sadd.s32 1, %s710_s16   ;;  %s932_s12 = smov %s702_s14 }
 0x11d   : > { %p11_p9 = scmp.ge.s32.totalorder %s14_s16, 6   ;;  %s933_s13 = smov %s706_s15 }
 0x11e   : > { %s934_s14 = smov %s937_s17  ;;  %s935_s15 = smov %s941_s18 }
 0x11f   :  { %13 = sbr.rel (!%p11_p9) target bundleno = 3 (0x3), region = 70 }

// kernel: double_conv.3
= control target key start
LH: loop header
LB: loop body
LE: loop exit
PB: predicated region body
PF: predicated region fallthrough
CT: control target
= control target key end

     0   :  { %s2254_s24 = smov 0   ;;  %s2256_s25 = smov 0   ;;  %s3147_s0 = inlined_call_operand.vmem [shape: f32[2,16,16,8], index: 0, kind: input, shape index: {}, may-alias: {0,1,2}]   ;;  %s3148_s1 = inlined_call_operand.vmem [shape: f32[2,16,16,8], index: 1, kind: input, shape index: {}, may-alias: {0,1,2}]   ;;  %s3149_s2 = inlined_call_operand.vmem [shape: f32[2,16,16,8], index: 2, kind: input, shape index: {}, may-alias: {0,1,2}]   ;;  %s3150_s3 = inlined_call_operand.vmem [shape: f32[1,8], index: 3, kind: input, shape index: {}]   ;;  %s3151_s4 = inlined_call_operand.vmem [shape: f32[1,8], index: 4, kind: input, shape index: {}]   ;;  %s3152_s5 = inlined_call_operand.vmem [shape: f32[3,24,128], index: 5, kind: input, shape index: {}]   ;;  %s3153_s6 = inlined_call_operand.vmem [shape: f32[2,16,16,8], index: 6, kind: output, shape index: {0}]   ;;  %s3154_s7 = inlined_call_operand.vmem [shape: f32[2,2,2,128], index: 7, kind: output, shape index: {1}]  }
   0x1   :  { %s2258_s26 = smov 0   ;;  %s2260_s27 = smov 0  }
   0x2   :  { %s2262_s28 = smov 0  }
   0x3 LB: > { %s27_s29 = sadd.s32 1, %s2200_s26  ;;  %s30_s30 = sadd.s32 1, %s2204_s27  ;;  %s2208_s28 = sphi %s2262_s28, %s18_s28   ;;  %s2204_s27 = sphi %s2260_s27, %s3159_s27   ;;  %s2200_s26 = sphi %s2258_s26, %s3158_s26   ;;  %s2196_s25 = sphi %s2256_s25, %s3157_s25   ;;  %s2192_s24 = sphi %s2254_s24, %s3156_s24  }
   0x4   : > { %p28_p0 = scmp.ge.s32.totalorder %s27_s29, 2  ;;  %p2021_p1 = scmp.ge.s32.totalorder %s2208_s28, 1 }
   0x5   : > { %p328_p2 = scmp.lt.s32.totalorder %s2208_s28, 5 }
   0x6   : > { %s3161_s29 = smov (%p28_p0, %s27_s29), 0  ;;  %s3163_s30 = smov (!%p28_p0, %s30_s30), %s2204_s27 }
   0x7   : > { %p329_p3 = pnand %p2021_p1, %p328_p2  ;;  %p32_p4 = scmp.ge.s32.totalorder %s3163_s30, 2 }
   0x8   : > { %s2287_s8 = sshll.u32 (!%p329_p3), %s2192_s24, 3  ;;  %p405_p5 = scmp.lt.s32.totalorder (!%p329_p3), %s2196_s25, 1 }
   0x9   : > { %s3165_s30 = smov (%p32_p4, %s3163_s30), 0  ;;  %332 = sbr.rel (%p329_p3) target bundleno = 628 (0x274), region = 44 }
   0xa   : > { %p407_p6 = scmp.lt.s32.totalorder (!%p329_p3), %s2287_s8, 15  ;;  %p462_p7 = scmp.lt.s32.totalorder (!%p329_p3), %s2192_s24, 1 }
   0xb   : > { %s2295_s13 = sadd.s32 (!%p329_p3), 4294967295, %s2287_s8  ;;  %s2114_s16 = sadd.s32 (!%p329_p3), 8, %s2287_s8 }
   0xc   : > { %p417_p8 = scmp.gt.s32.totalorder (!%p329_p3), %s2295_s13, 0  ;;  %p2028_p9 = scmp.lt.s32.totalorder (!%p329_p3), %s2295_s13, 15 }
   0xd   : > { %p2348_p10 = scmp.lt.s32.totalorder (!%p329_p3), %s2114_s16, 15  ;;  %p2049_p11 = scmp.ne.s32.totalorder (!%p329_p3), %s2192_s24, 0 }
   0xe   : > { %s3167_s25 = smov (!%p405_p5, %s2196_s25), 1  ;;  %v2301_v0 = vld [vmem:[%s3150_s3] ss:$0 sm:$0xff]  ;;  %vm541_vm0 = vcmask 64512  }
   0xf   : > { %s408_s9 = scalar_select %p407_p6, %s2287_s8, 15  ;;  %v2318_v1 = vld [vmem:[%s3151_s4] ss:$0 sm:$0xff] }
  0x10   : > { %s2292_s10 = sshll.u32 %s3167_s25, 5  ;;  %s2047_s11 = sshll.u32 %s3167_s25, 1 }
  0x11   : > { %s2023_s12 = sshll.u32 %s408_s9, 1  ;;  %s3171_s16 = smov (!%p2348_p10, %s2114_s16), 15 }
  0x12   : > { %s411_s14 = sadd.s32 %s2292_s10, %s2023_s12  ;;  %s3173_s16 = smov (!%p2348_p10, %s3171_s16), 15 }
  0x13   : > { %s2025_s17 = sshll.u32 %s411_s14, 3 }
  0x14   : > { %s2308_s20 = scalar_lea.vmem %s3147_s0, %s2025_s17  ;;  %s2313_s23 = scalar_lea.vmem %s3153_s6, %s2025_s17 }
  0x15   : > { %s463_s12 = scalar_select %p462_p7, %s2192_s24, 1  ;;  %v470_v2 = vld [vmem:[%s2308_s20] sm:$0xff]  ;;  %v471_v3 = vld [vmem:[%s2308_s20 + $0x8] sm:$0xff]  ;;  %v472_v4 = vld [vmem:[%s2308_s20 + $0x10] sm:$0xff] }
  0x16   : > { %v489_v5 = vmul.f32 %v2301_v0, %v470_v2  ;;  %v490_v6 = vmul.f32 %v2301_v0, %v471_v3  ;;  %v491_v7 = vmul.f32 %v2301_v0, %v472_v4  ;;  %v473_v8 = vld [vmem:[%s2308_s20 + $0x18] sm:$0xff]  ;;  %v474_v9 = vld [vmem:[%s2308_s20 + $0x20] sm:$0xff]  ;;  %v475_v10 = vld [vmem:[%s2308_s20 + $0x28] sm:$0xff]  ;;  %s2335_s14 = scalar_select %p417_p8, %s2295_s13, 0 }
  0x17   : > { %s465_s15 = sadd.s32 %s2047_s11, %s463_s12  ;;  %v492_v11 = vmul.f32 %v2301_v0, %v473_v8  ;;  %v493_v12 = vmul.f32 %v2301_v0, %v474_v9  ;;  %v494_v13 = vmul.f32 %v2301_v0, %v475_v10  ;;  %v476_v14 = vld [vmem:[%s2308_s20 + $0x30] sm:$0xff]  ;;  %v477_v15 = vld [vmem:[%s2308_s20 + $0x38] sm:$0xff]  ;;  %v478_v20 = vld [vmem:[%s2308_s20 + $0x40] sm:$0xff]  ;;  %s2040_s12 = sshll.u32 %s3173_s16, 1 }
  0x18   : > { %s2048_s17 = sshll.u32 %s465_s15, 1  ;;  %v508_v16 = vadd.f32 %v2318_v1, %v489_v5  ;;  %v509_v17 = vadd.f32 %v2318_v1, %v490_v6  ;;  %v510_v18 = vadd.f32 %v2318_v1, %v491_v7  ;;  %v495_v19 = vmul.f32 %v2301_v0, %v476_v14  ;;  %v479_v25 = vld [vmem:[%s2308_s20 + $0x48] sm:$0xff]  ;;  %v480_v26 = vld [vmem:[%s2308_s20 + $0x50] sm:$0xff]  ;;  %v481_v27 = vld [vmem:[%s2308_s20 + $0x58] sm:$0xff]  ;;  %s3169_s14 = smov (!%p2028_p9, %s2335_s14), 15 }
  0x19   : > { %s2355_s19 = scalar_lea.vmem %s3154_s7, %s2048_s17  ;;  %v511_v21 = vadd.f32 %v2318_v1, %v492_v11  ;;  %v512_v22 = vadd.f32 %v2318_v1, %v493_v12  ;;  %v513_v23 = vadd.f32 %v2318_v1, %v494_v13  ;;  %v496_v24 = vmul.f32 %v2301_v0, %v477_v15  ;;  %v482_v32 = vld [vmem:[%s2308_s20 + $0x60] sm:$0xff]  ;;  %v483_v33 = vld [vmem:[%s2308_s20 + $0x68] sm:$0xff]  ;;  %v484_v37 = vld [vmem:[%s2308_s20 + $0x70] sm:$0xff]  ;;  %s2033_s13 = sshll.u32 %s3169_s14, 1 }
  0x1a   : > { %v524_v28 = vmax.f32 %v508_v16, 0.0  ;;  %v525_v29 = vmax.f32 %v509_v17, 0.0  ;;  %v526_v30 = vmax.f32 %v510_v18, 0.0  ;;  %v514_v31 = vadd.f32 %v2318_v1, %v495_v19  ;;  %v485_v42 = vld [vmem:[%s2308_s20 + $0x78] sm:$0xff]  ;;  %s425_s21 = sadd.s32 %s2033_s13, %s2292_s10  ;;  %s442_s14 = sadd.s32 %s2040_s12, %s2292_s10 }
  0x1b   : > { %v527_v34 = vmax.f32 %v511_v21, 0.0  ;;  %v528_v35 = vmax.f32 %v512_v22, 0.0  ;;  %v515_v36 = vadd.f32 %v2318_v1, %v496_v24  ;;  %v529_v38 = vmax.f32 %v513_v23, 0.0  ;;  %s2035_s20 = sshll.u32 %s425_s21, 3  ;;  %s2042_s15 = sshll.u32 %s442_s14, 3 }
  0x1c   : > { %542 = vst.msk [vmem:[#allocation2 + $0x10] sm:$0xff] %vm541_vm0, %v524_v28  ;;  %v497_v39 = vmul.f32 %v2301_v0, %v478_v20  ;;  %v498_v40 = vmul.f32 %v2301_v0, %v479_v25  ;;  %v499_v41 = vmul.f32 %v2301_v0, %v480_v26  ;;  %v530_v43 = vmax.f32 %v514_v31, 0.0  ;;  %s427_s9 = scalar_lea.vmem %s3148_s1, %s2035_s20  ;;  %s444_s18 = scalar_lea.vmem %s3149_s2, %s2042_s15 }
  0x1d   : > { %543 = vst.msk [vmem:[#allocation2 + $0x18] sm:$0xff] %vm541_vm0, %v525_v29  ;;  %v500_v44 = vmul.f32 %v2301_v0, %v481_v27  ;;  %v501_v45 = vmul.f32 %v2301_v0, %v482_v32  ;;  %v502_v46 = vmul.f32 %v2301_v0, %v483_v33  ;;  %v503_v50 = vmul.f32 %v2301_v0, %v484_v37  ;;  %v558_v56 = vld [vmem:[%s427_s9] sm:$0xff]  ;;  %v559_v57 = vld [vmem:[%s427_s9 + $0x8] sm:$0xff] }
  0x1e   : > { %544 = vst.msk [vmem:[#allocation2 + $0x20] sm:$0xff] %vm541_vm0, %v526_v30  ;;  %v516_v47 = vadd.f32 %v2318_v1, %v497_v39  ;;  %v517_v48 = vadd.f32 %v2318_v1, %v498_v40  ;;  %v518_v49 = vadd.f32 %v2318_v1, %v499_v41  ;;  %v531_v51 = vmax.f32 %v515_v36, 0.0  ;;  %v568_v10 = vld [vmem:[%s444_s18] sm:$0xff]  ;;  %v569_v11 = vld [vmem:[%s444_s18 + $0x8] sm:$0xff] }
  0x1f   : > { %545 = vst.msk [vmem:[#allocation2 + $0x28] sm:$0xff] %vm541_vm0, %v527_v34  ;;  %v519_v52 = vadd.f32 %v2318_v1, %v500_v44  ;;  %v504_v53 = vmul.f32 %v2301_v0, %v485_v42  ;;  %v520_v55 = vadd.f32 %v2318_v1, %v501_v45  ;;  %v521_v59 = vadd.f32 %v2318_v1, %v502_v46 }
  0x20   : > { %546 = vst.msk [vmem:[#allocation2 + $0x30] sm:$0xff] %vm541_vm0, %v528_v35  ;;  %v532_v54 = vmax.f32 %v516_v47, 0.0  ;;  %v533_v58 = vmax.f32 %v517_v48, 0.0  ;;  %v534_v60 = vmax.f32 %v518_v49, 0.0  ;;  %v522_v61 = vadd.f32 %v2318_v1, %v503_v50 }
  0x21   : > { %547 = vst.msk [vmem:[#allocation2 + $0x38] sm:$0xff] %vm541_vm0, %v529_v38  ;;  %v560_v62 = vmul.f32 %v2301_v0, %v558_v56  ;;  %v561_v63 = vmul.f32 %v2301_v0, %v559_v57  ;;  %v535_v2 = vmax.f32 %v519_v52, 0.0  ;;  %v523_v3 = vadd.f32 %v2318_v1, %v504_v53 }
  0x22   : > { %548 = vst.msk [vmem:[#allocation2 + $0x40] sm:$0xff] %vm541_vm0, %v530_v43  ;;  %v536_v4 = vmax.f32 %v520_v55, 0.0  ;;  %v537_v6 = vmax.f32 %v521_v59, 0.0  ;;  %v538_v8 = vmax.f32 %v522_v61, 0.0  ;;  %v570_v13 = vmul.f32 %v2301_v0, %v568_v10 }
  0x23   : > { %549 = vst.msk [vmem:[#allocation2 + $0x48] sm:$0xff] %vm541_vm0, %v531_v51  ;;  %v562_v5 = vadd.f32 %v2318_v1, %v560_v62  ;;  %v563_v7 = vadd.f32 %v2318_v1, %v561_v63  ;;  %v539_v9 = vmax.f32 %v523_v3, 0.0  ;;  %v571_v14 = vmul.f32 %v2301_v0, %v569_v11 }
  0x24   : > { %550 = vst.msk [vmem:[#allocation2 + $0x50] sm:$0xff] %vm541_vm0, %v532_v54  ;;  %v572_v16 = vadd.f32 %v2318_v1, %v570_v13 }
  0x25   : > { %551 = vst.msk [vmem:[#allocation2 + $0x58] sm:$0xff] %vm541_vm0, %v533_v58  ;;  %v564_v12 = vmax.f32 %v562_v5, 0.0  ;;  %v565_v15 = vmax.f32 %v563_v7, 0.0  ;;  %v573_v17 = vadd.f32 %v2318_v1, %v571_v14 }
  0x26   : > { %552 = vst.msk [vmem:[#allocation2 + $0x60] sm:$0xff] %vm541_vm0, %v534_v60  ;;  %v574_v18 = vmax.f32 %v572_v16, 0.0 }
  0x27   : > { %553 = vst.msk [vmem:[#allocation2 + $0x68] sm:$0xff] %vm541_vm0, %v535_v2  ;;  %v575_v19 = vmax.f32 %v573_v17, 0.0 }
  0x28   : > { %554 = vst.msk [vmem:[#allocation2 + $0x70] sm:$0xff] %vm541_vm0, %v536_v4 }
  0x29   : > { %555 = vst.msk [vmem:[#allocation2 + $0x78] sm:$0xff] %vm541_vm0, %v537_v6 }
  0x2a   : > { %556 = vst.msk [vmem:[#allocation2 + $0x80] sm:$0xff] %vm541_vm0, %v538_v8 }
  0x2b   : > { %557 = vst.msk [vmem:[#allocation2 + $0x88] sm:$0xff] %vm541_vm0, %v539_v9  ;;  %582 = sbr.rel (%p2049_p11) target bundleno = 51 (0x33), region = 48 }
  0x2c   : > { %566 = vst.msk [vmem:[#allocation2] sm:$0xff] %vm541_vm0, %v564_v12 }
  0x2d   : > { %567 = vst.msk [vmem:[#allocation2 + $0x8] sm:$0xff] %vm541_vm0, %v565_v15 }
  0x2e   : > { %577 = vst.msk [vmem:[#allocation2 + $0x90] sm:$0xff] %vm541_vm0, %v574_v18 }
  0x2f   : > { %578 = vst.msk [vmem:[#allocation2 + $0x98] sm:$0xff] %vm541_vm0, %v575_v19 }
  0x30   : > { %v2210_v0 = vmov 0.0  }
  0x31   : > { %583 = vst.msk [vmem:[#allocation2] sm:$0xff] %vm541_vm0, %v2210_v0 }
  0x32   : > { %584 = vst.msk [vmem:[#allocation2 + $0x8] sm:$0xff] %vm541_vm0, %v2210_v0 }
  0x33 PF: > { %p2050_p12 = scmp.ne.s32.totalorder %s2192_s24, 1 }
  0x35   : > { %588 = sbr.rel (%p2050_p12) target bundleno = 61 (0x3d), region = 52 }
  0x3a   : > { %v2211_v1 = vmov 0.0  }
  0x3b   : > { %589 = vst.msk [vmem:[#allocation2 + $0x90] sm:$0xff] %vm541_vm0, %v2211_v1 }
  0x3c   : > { %590 = vst.msk [vmem:[#allocation2 + $0x98] sm:$0xff] %vm541_vm0, %v2211_v1 }
  0x3d PF: > { %v2438_v20 = vld [vmem:[#allocation2 + $0x20] sm:$0xff]  ;;  %v2442_v22 = vld [vmem:[#allocation2 + $0x28] sm:$0xff]  ;;  %s2212_s10 = smov 8   ;;  %vm672_vm1 = vcmask 1046528   ;;  %v2454_v28 = vld [vmem:[#allocation2 + $0x18] sm:$0xff]  ;;  %s2213_s24 = smov 16  }
  0x3e   : > { %v2440_v21 = vld [vmem:[#allocation2] sm:$0xff]  ;;  %1461 = vrot.lane.b32.xlu0 %v2438_v20, %s2212_s10  ;;  %v2449_v24 = vld [vmem:[#allocation2 + $0x8] sm:$0xff]  ;;  %v1421_v25 = vrot.slane %v2438_v20, 1  ;;  %v1422_v26 = vrot.slane %v2442_v22, 1  ;;  %v2457_v30 = vld [vmem:[#allocation2 + $0x10] sm:$0xff]  ;;  %v934_v33 = vrot.slane %v2454_v28, 1 }
  0x3f   : > { %713 = vrot.lane.b32.xlu1 %v2440_v21, %s2212_s10  ;;  %v673_v23 = vrot.slane %v2440_v21, 1  ;;  %v674_v27 = vrot.slane %v2449_v24, 1  ;;  %v933_v32 = vrot.slane %v2457_v30, 1  ;;  %v2470_v35 = vld [vmem:[#allocation2 + $0x78] sm:$0xff]  ;;  %v2472_v36 = vld [vmem:[#allocation2 + $0x70] sm:$0xff]  ;;  %v2524_v49 = vld [vmem:[#allocation2 + $0x80] sm:$0xff] }
  0x40   : > { %v2461_v31 = vsel %vm672_vm1, %v1421_v25, %v1422_v26  ;;  %v951_v37 = vrot.slane %v2472_v36, 1  ;;  %v952_v38 = vrot.slane %v2470_v35, 1  ;;  %v2487_v40 = vsel %vm672_vm1, %v1422_v26, 0.0  ;;  %v2499_v43 = vld [vmem:[#allocation2 + $0x38] sm:$0xff]  ;;  %v2501_v44 = vld [vmem:[#allocation2 + $0x30] sm:$0xff]  ;;  %v2526_v50 = vld [vmem:[#allocation2 + $0x88] sm:$0xff] }
  0x41   : > { %v675_v29 = vsel %vm672_vm1, %v673_v23, %v674_v27  ;;  %v935_v34 = vsel %vm672_vm1, %v933_v32, %v934_v33  ;;  %v705_v41 = vsel %vm672_vm1, %v674_v27, 0.0  ;;  %v965_v42 = vsel %vm672_vm1, %v934_v33, 0.0  ;;  %v2553_v55 = vld [vmem:[#allocation2 + $0x40] sm:$0xff]  ;;  %v2555_v56 = vld [vmem:[#allocation2 + $0x48] sm:$0xff]  ;;  %v852_v60 = vld [vmem:[%s3152_s5 + $0x10] sm:$0xff] }
  0x42   : > { %769 = vrot.lane.b32.xlu2 %v675_v29, %s2213_s24  ;;  %v2482_v39 = vsel %vm672_vm1, %v951_v37, %v952_v38  ;;  %v1424_v45 = vrot.slane %v2501_v44, 1  ;;  %v2507_v46 = vsel %vm672_vm1, %v952_v38, 0.0  ;;  %v1425_v47 = vrot.slane %v2499_v43, 1  ;;  %1288 = vmatpush.msra.mxu1 %v852_v60  ;;  %v851_v61 = vld [vmem:[%s3152_s5 + $0x8] sm:$0xff]  ;;  %v2575_v62 = vld [vmem:[%s3152_s5 + $0x40] sm:$0xff]  ;;  %v2596_v4 = vld [vmem:[%s3152_s5 + $0x38] sm:$0xff] }
  0x43   : > { %v954_v51 = vrot.slane %v2524_v49, 1  ;;  %v955_v52 = vrot.slane %v2526_v50, 1  ;;  %v1427_v57 = vrot.slane %v2553_v55, 1  ;;  %v1428_v58 = vrot.slane %v2555_v56, 1  ;;  %v850_v63 = vld [vmem:[%s3152_s5] sm:$0xff]  ;;  %1662 = vmatpush.msra.mxu2 %v2575_v62  ;;  %v2053_v2 = vld [vmem:[%s3152_s5 + $0x28] sm:$0xff] }
  0x44   : > { %v2515_v48 = vsel %vm672_vm1, %v1424_v45, %v1425_v47  ;;  %v2540_v54 = vsel %vm672_vm1, %v1425_v47, 0.0  ;;  %1289 = vmatpush.msra.mxu1 %v851_v61  ;;  %1175 = vmatpush.msra.mxu0 %v2053_v2  ;;  %v2052_v5 = vld [vmem:[%s3152_s5 + $0x20] sm:$0xff]  ;;  %v2605_v6 = vld [vmem:[%s3152_s5 + $0x30] sm:$0xff]  ;;  %v2051_v7 = vld [vmem:[%s3152_s5 + $0x18] sm:$0xff]  ;;  %v624_v16 = vrot.slane %v2440_v21, 7  ;;  %vm623_vm2 = vcmask 1040384  }
  0x45   : > { %v2537_v53 = vsel %vm672_vm1, %v954_v51, %v955_v52  ;;  %v2564_v59 = vsel %vm672_vm1, %v955_v52, 0.0  ;;  %v2587_v3 = vsel %vm672_vm1, %v1427_v57, %v1428_v58  ;;  %2115 = vmatpush.msra.mxu3 %v2053_v2  ;;  %1663 = vmatpush.msra.mxu2 %v2596_v4  ;;  %v2613_v8 = vld [vmem:[#allocation2 + $0x60] sm:$0xff]  ;;  %v2615_v9 = vld [vmem:[#allocation2 + $0x68] sm:$0xff]  ;;  %v2633_v15 = vsel %vm672_vm1, %v1428_v58, 0.0  ;;  %v2652_v27 = vld [vmem:[#allocation2 + $0x50] sm:$0xff] }
  0x46   : > { %1517 = vrot.lane.b32.xlu0 %v2461_v31, %s2213_s24  ;;  %1290 = vmatpush.msra.mxu1 %v850_v63  ;;  %v691_v11 = vrot.slane %v2613_v8, 1  ;;  %v692_v12 = vrot.slane %v2615_v9, 1  ;;  %v664_v18 = vsel %vm623_vm2, 0.0, %v624_v16  ;;  %vm833_vm3 = vcmask 130048   ;;  %v2654_v29 = vld [vmem:[#allocation2 + $0x58] sm:$0xff] }
  0x47   : > { %973 = vrot.lane.b32.xlu1 %v2457_v30, %s2212_s10  ;;  %1176 = vmatpush.msra.mxu0 %v2052_v5  ;;  %vm1113_vm4 = vcmask 195584   ;;  %v1373_v1 = vrot.slane %v2438_v20, 7  ;;  %v885_v26 = vrot.slane %v2457_v30, 7  ;;  %v1431_v33 = vrot.slane %v2654_v29, 1 }
  0x48   : > { %2116 = vmatpush.msra.mxu3 %v2052_v5  ;;  %1664 = vmatpush.msra.mxu2 %v2605_v6  ;;  %v2626_v13 = vsel %vm672_vm1, %v691_v11, %v692_v12  ;;  %v903_v45 = vrot.slane %v2472_v36, 7  ;;  %v2680_v47 = vsel %vm672_vm1, %v692_v12, 0.0  ;;  %v625_v12 = vrot.slane %v2449_v24, 7 }
  0x49   : > { %1177 = vmatpush.msra.mxu0 %v2051_v7  ;;  %v2657_v32 = vsel %vm623_vm2, 0.0, %v1373_v1  ;;  %v904_v21 = vrot.slane %v2470_v35, 7 }
  0x4a   : > { %1029 = vrot.lane.b32.xlu2 %v935_v34, %s2213_s24  ;;  %2117 = vmatpush.msra.mxu3 %v2051_v7  ;;  %v2690_v57 = vsel %vm623_vm2, 0.0, %v903_v45 }
  0x4c   : > { %2118 = vmatpush.msrb.mxu3 %v852_v60 }
  0x4e   : > { %997 = vrot.lane.b32.xlu0 %v2472_v36, %s2212_s10  ;;  %2119 = vmatpush.msrb.mxu3 %v851_v61 }
  0x4f   : > { %1463 = vrot.lane.b32.xlu1 %v2442_v22, %s2212_s10 }
  0x50   : > { %2120 = vmatpush.msrb.mxu3 %v850_v63  ;;  %v1374_v63 = vrot.slane %v2442_v22, 7 }
  0x52   : > { %1053 = vrot.lane.b32.xlu2 %v2482_v39, %s2213_s24  ;;  %v2701_v7 = vsel %vm623_vm2, %v1373_v1, %v1374_v63  ;;  %v2737_v1 = vsel %vm672_vm1, %v1431_v33, 0.0 }
  0x56   : > { %1519 = vrot.lane.b32.xlu0 %v2487_v40, %s2213_s24 }
  0x57   : > { %715 = vrot.lane.b32.xlu1 %v2449_v24, %s2212_s10 }
  0x5a   : > { %975 = vrot.lane.b32.xlu2 %v2454_v28, %s2212_s10 }
  0x5e   : > { %771 = vrot.lane.b32.xlu0 %v705_v41, %s2213_s24 }
  0x5f   : > { %1031 = vrot.lane.b32.xlu1 %v965_v42, %s2213_s24 }
  0x62   : > { %999 = vrot.lane.b32.xlu2 %v2470_v35, %s2212_s10 }
  0x66   : > { %1465 = vrot.lane.b32.xlu0 %v2501_v44, %s2212_s10 }
  0x67   : > { %1055 = vrot.lane.b32.xlu1 %v2507_v46, %s2213_s24 }
  0x6a   : > { %1521 = vrot.lane.b32.xlu2 %v2515_v48, %s2213_s24 }
  0x6e   : > { %717 = vrot.lane.b32.xlu0 %v2457_v30, %s2212_s10  ;;  %v1430_v30 = vrot.slane %v2652_v27, 1 }
  0x6f   : > { %977 = vrot.lane.b32.xlu1 %v2438_v20, %s2212_s10 }
  0x70   : > { %v2683_v51 = vsel %vm672_vm1, %v1430_v30, %v1431_v33 }
  0x72   : > { %773 = vrot.lane.b32.xlu2 %v935_v34, %s2213_s24 }
  0x76   : > { %1033 = vrot.lane.b32.xlu0 %v2461_v31, %s2213_s24 }
  0x77   : > { %1001 = vrot.lane.b32.xlu1 %v2524_v49, %s2212_s10 }
  0x7a   : > { %1467 = vrot.lane.b32.xlu2 %v2499_v43, %s2212_s10 }
  0x7e   : > { %1057 = vrot.lane.b32.xlu0 %v2537_v53, %s2213_s24 }
  0x7f   : > { %1523 = vrot.lane.b32.xlu1 %v2540_v54, %s2213_s24 }
  0x82   : > { %719 = vrot.lane.b32.xlu2 %v2454_v28, %s2212_s10 }
  0x86   : > { %979 = vrot.lane.b32.xlu0 %v2442_v22, %s2212_s10 }
  0x87   : > { %775 = vrot.lane.b32.xlu1 %v965_v42, %s2213_s24 }
  0x8a   : > { %1035 = vrot.lane.b32.xlu2 %v2487_v40, %s2213_s24 }
  0x8e   : > { %1003 = vrot.lane.b32.xlu0 %v2526_v50, %s2212_s10 }
  0x8f   : > { %1469 = vrot.lane.b32.xlu1 %v2553_v55, %s2212_s10 }
  0x92   : > { %1059 = vrot.lane.b32.xlu2 %v2564_v59, %s2213_s24 }
  0x96   : > { %1525 = vrot.lane.b32.xlu0 %v2587_v3, %s2213_s24 }
  0x97   : > { %721 = vrot.lane.b32.xlu1 %v2438_v20, %s2212_s10  ;;  %v2664_v20 = vsel %vm623_vm2, 0.0, %v885_v26 }
  0x9a   : > { %981 = vrot.lane.b32.xlu2 %v2501_v44, %s2212_s10 }
  0x9c   : > { %v770_v10 = vpop.permute.xlu2 %769 }
  0x9e   : > { %777 = vrot.lane.b32.xlu0 %v2461_v31, %s2213_s24 }
  0x9f   : > { %1037 = vrot.lane.b32.xlu1 %v2515_v48, %s2213_s24 }
  0xa2   : > { %737 = vrot.lane.b32.xlu2 %v2613_v8, %s2212_s10 }
  0xa4   : > { %v1030_v14 = vpop.permute.xlu2 %1029 }
  0xa6   : > { %1471 = vrot.lane.b32.xlu0 %v2555_v56, %s2212_s10 }
  0xa7   : > { %793 = vrot.lane.b32.xlu1 %v2626_v13, %s2213_s24 }
  0xaa   : > { %1527 = vrot.lane.b32.xlu2 %v2633_v15, %s2213_s24 }
  0xac   : > { %v1054_v17 = vpop.permute.xlu2 %1053 }
  0xae   : > { %723 = vrot.lane.b32.xlu0 %v2442_v22, %s2212_s10 }
  0xaf   : > { %983 = vrot.lane.b32.xlu1 %v2499_v43, %s2212_s10 }
  0xb0   : > { %v1462_v19 = vpop.permute.xlu0 %1461 }
  0xb1   : > { %v714_v0 = vpop.permute.xlu1 %713  ;;  %v1565_v34 = vsel %vm541_vm0, %v2657_v32, %v1462_v19 }
  0xb2   : > { %v817_v23 = vsel %vm541_vm0, %v664_v18, %v714_v0  ;;  %779 = vrot.lane.b32.xlu2 %v2487_v40, %s2213_s24  ;;  %v1376_v0 = vrot.slane %v2501_v44, 7 }
  0xb3   : > { %v834_v25 = vsel %vm833_vm3, %v817_v23, %v770_v10 }
  0xb4   : > { %2070 = vmatmul.msk.f32.vlgmr.msra.gmra.mxu1 %vm1113_vm4, %v834_v25  ;;  %v976_v31 = vpop.permute.xlu2 %975  ;;  %v2742_v25 = vsel %vm623_vm2, %v903_v45, %v904_v21  ;;  %v907_v21 = vrot.slane %v2526_v50, 7 }
  0xb6   : > { %1039 = vrot.lane.b32.xlu0 %v2540_v54, %s2213_s24 }
  0xb7   : > { %739 = vrot.lane.b32.xlu1 %v2615_v9, %s2212_s10 }
  0xb8   : > { %v1518_v37 = vpop.permute.xlu0 %1517 }
  0xb9   : > { %v974_v38 = vpop.permute.xlu1 %973  ;;  %v1581_v41 = vsel %vm833_vm3, %v1565_v34, %v1518_v37 }
  0xba   : > { %v1077_v40 = vsel %vm541_vm0, %v2664_v20, %v974_v38  ;;  %2089 = vmatmul.msk.f32.vlgmr.msra.gmra.mxu2 %vm1113_vm4, %v1581_v41  ;;  %1473 = vrot.lane.b32.xlu2 %v2652_v27, %s2212_s10 }
  0xbb   : > { %v1093_v42 = vsel %vm833_vm3, %v1077_v40, %v1030_v14 }
  0xbc   : > { %2054 = vmatmul.msk.f32.vlgmr.msra.gmra.mxu0 %vm1113_vm4, %v1093_v42  ;;  %v1000_v52 = vpop.permute.xlu2 %999 }
  0xbe   : > { %795 = vrot.lane.b32.xlu0 %v2680_v47, %s2213_s24 }
  0xbf   : > { %1529 = vrot.lane.b32.xlu1 %v2683_v51, %s2213_s24 }
  0xc0   : > { %v998_v58 = vpop.permute.xlu0 %997 }
  0xc1   : > { %v1464_v60 = vpop.permute.xlu1 %1463  ;;  %v1089_v61 = vsel %vm541_vm0, %v2690_v57, %v998_v58 }
  0xc2   : > { %v1105_v2 = vsel %vm833_vm3, %v1089_v61, %v1054_v17  ;;  %725 = vrot.lane.b32.xlu2 %v2501_v44, %s2212_s10  ;;  %v1566_v22 = vsel %vm541_vm0, %v2701_v7, %v1464_v60  ;;  %v1090_v44 = vsel %vm541_vm0, %v2742_v25, %v1000_v52  ;;  %v1377_v61 = vrot.slane %v2499_v43, 7 }
  0xc3   : > { %2066 = vmatmul.msk.f32.vlgmr.msra.gmra.mxu3 %vm1113_vm4, %v1105_v2 }
  0xc4   : > { %v1522_v5 = vpop.permute.xlu2 %1521  ;;  %2121 = vmatpush.msra.mxu3 %v2575_v62  ;;  %v886_v62 = vrot.slane %v2454_v28, 7 }
  0xc6   : > { %985 = vrot.lane.b32.xlu0 %v2553_v55, %s2212_s10  ;;  %2122 = vmatpush.msra.mxu3 %v2596_v4  ;;  %v626_v4 = vsel %vm623_vm2, %v624_v16, %v625_v12  ;;  %v2721_v17 = vsel %vm623_vm2, %v885_v26, %v886_v62  ;;  %v2749_v26 = vsel %vm623_vm2, 0.0, %v1376_v0 }
  0xc7   : > { %781 = vrot.lane.b32.xlu1 %v2515_v48, %s2213_s24  ;;  %v1078_v28 = vsel %vm541_vm0, %v2721_v17, %v976_v31 }
  0xc8   : > { %v1520_v10 = vpop.permute.xlu0 %1519  ;;  %2123 = vmatpush.msra.mxu3 %v2605_v6 }
  0xc9   : > { %v716_v11 = vpop.permute.xlu1 %715  ;;  %v1582_v14 = vsel %vm833_vm3, %v1566_v22, %v1520_v10  ;;  %v2787_v22 = vsel %vm623_vm2, %v1376_v0, %v1377_v61 }
  0xca   : > { %2090 = vmatmul.msk.f32.gmra.mxu2 %vm1113_vm4, %v1582_v14  ;;  %1041 = vrot.lane.b32.xlu2 %v2587_v3, %s2213_s24  ;;  %v818_v24 = vsel %vm541_vm0, %v626_v4, %v716_v11 }
  0xcc   : > { %v774_v48 = vpop.permute.xlu2 %773 }
  0xce   : > { %741 = vrot.lane.b32.xlu0 %v2472_v36, %s2212_s10 }
  0xcf   : > { %1475 = vrot.lane.b32.xlu1 %v2654_v29, %s2212_s10 }
  0xd0   : > { %v772_v6 = vpop.permute.xlu0 %771 }
  0xd1   : > { %v1032_v18 = vpop.permute.xlu1 %1031  ;;  %v835_v19 = vsel %vm833_vm3, %v818_v24, %v772_v6 }
  0xd2   : > { %v1094_v16 = vsel %vm833_vm3, %v1078_v28, %v1032_v18  ;;  %2071 = vmatmul.msk.f32.gmra.mxu1 %vm1113_vm4, %v835_v19  ;;  %797 = vrot.lane.b32.xlu2 %v2482_v39, %s2213_s24 }
  0xd3   : > { %2055 = vmatmul.msk.f32.gmra.mxu0 %vm1113_vm4, %v1094_v16 }
  0xd4   : > { %v1468_v23 = vpop.permute.xlu2 %1467 }
  0xd5   : > { %v1568_v10 = vsel %vm541_vm0, %v2787_v22, %v1468_v23 }
  0xd6   : > { %1531 = vrot.lane.b32.xlu0 %v2737_v1, %s2213_s24 }
  0xd7   : > { %727 = vrot.lane.b32.xlu1 %v2499_v43, %s2212_s10 }
  0xd8   : > { %v1466_v31 = vpop.permute.xlu0 %1465 }
  0xd9   : > { %v1056_v30 = vpop.permute.xlu1 %1055  ;;  %v1567_v33 = vsel %vm541_vm0, %v2749_v26, %v1466_v31 }
  0xda   : > { %v1106_v34 = vsel %vm833_vm3, %v1090_v44, %v1056_v30  ;;  %v1583_v37 = vsel %vm833_vm3, %v1567_v33, %v1522_v5  ;;  %987 = vrot.lane.b32.xlu2 %v2555_v56, %s2212_s10  ;;  %v1379_v44 = vrot.slane %v2553_v55, 7 }
  0xdb   : > { %2067 = vmatmul.msk.f32.gmra.mxu3 %vm1113_vm4, %v1106_v34  ;;  %2091 = vmatmul.msk.f32.gmra.mxu2 %vm1113_vm4, %v1583_v37 }
  0xdc   : > { %v720_v38 = vpop.permute.xlu2 %719 }
  0xdd   : > { %v820_v4 = vsel %vm541_vm0, %v2721_v17, %v720_v38 }
  0xde   : > { %783 = vrot.lane.b32.xlu0 %v2540_v54, %s2213_s24 }
  0xdf   : > { %1043 = vrot.lane.b32.xlu1 %v2633_v15, %s2213_s24 }
  0xe0   : > { %v718_v40 = vpop.permute.xlu0 %717 }
  0xe1   : > { %v978_v41 = vpop.permute.xlu1 %977  ;;  %v819_v42 = vsel %vm541_vm0, %v2664_v20, %v718_v40  ;;  %v906_v20 = vrot.slane %v2524_v49, 7 }
  0xe2   : > { %v836_v45 = vsel %vm833_vm3, %v819_v42, %v774_v48  ;;  %743 = vrot.lane.b32.xlu2 %v2470_v35, %s2212_s10  ;;  %v1079_v54 = vsel %vm541_vm0, %v2657_v32, %v978_v41  ;;  %v642_v42 = vrot.slane %v2613_v8, 7 }
  0xe3   : > { %2072 = vmatmul.msk.f32.gmra.mxu1 %vm1113_vm4, %v836_v45  ;;  %v2784_v5 = vsel %vm623_vm2, 0.0, %v906_v20  ;;  %v2823_v17 = vsel %vm623_vm2, %v906_v20, %v907_v21 }
  0xe4   : > { %v1036_v52 = vpop.permute.xlu2 %1035 }
  0xe6   : > { %1477 = vrot.lane.b32.xlu0 %v2613_v8, %s2212_s10 }
  0xe7   : > { %799 = vrot.lane.b32.xlu1 %v2507_v46, %s2213_s24 }
  0xe8   : > { %v1034_v58 = vpop.permute.xlu0 %1033 }
  0xe9   : > { %v1002_v60 = vpop.permute.xlu1 %1001  ;;  %v1095_v63 = vsel %vm833_vm3, %v1079_v54, %v1034_v58 }
  0xea   : > { %2056 = vmatmul.msk.f32.gmra.mxu0 %vm1113_vm4, %v1095_v63  ;;  %1533 = vrot.lane.b32.xlu2 %v2626_v13, %s2213_s24  ;;  %v1091_v43 = vsel %vm541_vm0, %v2784_v5, %v1002_v60 }
  0xec   : > { %v1060_v2 = vpop.permute.xlu2 %1059 }
  0xee   : > { %729 = vrot.lane.b32.xlu0 %v2553_v55, %s2212_s10 }
  0xef   : > { %989 = vrot.lane.b32.xlu1 %v2652_v27, %s2212_s10 }
  0xf0   : > { %v1058_v11 = vpop.permute.xlu0 %1057 }
  0xf1   : > { %v1524_v12 = vpop.permute.xlu1 %1523  ;;  %v1107_v62 = vsel %vm833_vm3, %v1091_v43, %v1058_v11  ;;  %v2889_v11 = vld [vmem:[#allocation2 + $0x90] sm:$0xff] }
  0xf2   : > { %v1584_v14 = vsel %vm833_vm3, %v1568_v10, %v1524_v12  ;;  %2068 = vmatmul.msk.f32.gmra.mxu3 %vm1113_vm4, %v1107_v62  ;;  %785 = vrot.lane.b32.xlu2 %v2587_v3, %s2213_s24  ;;  %v2891_v12 = vld [vmem:[#allocation2 + $0x98] sm:$0xff] }
  0xf3   : > { %2092 = vmatmul.msk.f32.gmra.mxu2 %vm1113_vm4, %v1584_v14 }
  0xf4   : > { %v982_v48 = vpop.permute.xlu2 %981 }
  0xf5   : > { %v1081_v38 = vsel %vm541_vm0, %v2749_v26, %v982_v48 }
  0xf6   : > { %1045 = vrot.lane.b32.xlu0 %v2683_v51, %s2213_s24 }
  0xf7   : > { %1479 = vrot.lane.b32.xlu1 %v2615_v9, %s2212_s10 }
  0xf8   : > { %v980_v24 = vpop.permute.xlu0 %979 }
  0xf9   : > { %v776_v28 = vpop.permute.xlu1 %775  ;;  %v1080_v6 = vsel %vm541_vm0, %v2701_v7, %v980_v24 }
  0xfa   : > { %v837_v18 = vsel %vm833_vm3, %v820_v4, %v776_v28  ;;  %v1096_v3 = vsel %vm833_vm3, %v1080_v6, %v1036_v52  ;;  %1485 = vrot.lane.b32.xlu2 %v2524_v49, %s2212_s10  ;;  %v1382_v4 = vrot.slane %v2652_v27, 7 }
  0xfb   : > { %2073 = vmatmul.msk.f32.gmra.mxu1 %vm1113_vm4, %v837_v18  ;;  %2057 = vmatmul.msk.f32.gmra.mxu0 %vm1113_vm4, %v1096_v3 }
  0xfc   : > { %v738_v16 = vpop.permute.xlu2 %737 }
  0xfe   : > { %1535 = vrot.lane.b32.xlu0 %v2680_v47, %s2213_s24 }
  0xff   : > { %1541 = vrot.lane.b32.xlu1 %v2537_v53, %s2213_s24  ;;  %v2833_v53 = vsel %vm623_vm2, 0.0, %v1379_v44 }
 0x100   : > { %v1004_v19 = vpop.permute.xlu0 %1003 }
 0x101   : > { %v1470_v0 = vpop.permute.xlu1 %1469  ;;  %v1092_v23 = vsel %vm541_vm0, %v2823_v17, %v1004_v19 }
 0x102   : > { %v1108_v31 = vsel %vm833_vm3, %v1092_v23, %v1060_v2  ;;  %731 = vrot.lane.b32.xlu2 %v2555_v56, %s2212_s10  ;;  %v1569_v55 = vsel %vm541_vm0, %v2833_v53, %v1470_v0 }
 0x103   : > { %2069 = vmatmul.msk.f32.gmra.mxu3 %vm1113_vm4, %v1108_v31 }
 0x104   : > { %v1528_v49 = vpop.permute.xlu2 %1527 }
 0x106   : > { %991 = vrot.lane.b32.xlu0 %v2654_v29, %s2212_s10 }
 0x107   : > { %787 = vrot.lane.b32.xlu1 %v2633_v15, %s2213_s24 }
 0x108   : > { %v1526_v30 = vpop.permute.xlu0 %1525 }
 0x109   : > { %v722_v33 = vpop.permute.xlu1 %721  ;;  %v1585_v34 = vsel %vm833_vm3, %v1569_v55, %v1526_v30 }
 0x10a   : > { %2093 = vmatmul.msk.f32.gmra.mxu2 %vm1113_vm4, %v1585_v34  ;;  %1047 = vrot.lane.b32.xlu2 %v2737_v1, %s2213_s24  ;;  %v821_v15 = vsel %vm541_vm0, %v2657_v32, %v722_v33  ;;  %v2862_v32 = vsel %vm623_vm2, 0.0, %v642_v42 }
 0x10b   : > { %v829_v58 = vsel %vm541_vm0, %v2862_v32, %v738_v16 }
 0x10c   : > { %v780_v37 = vpop.permute.xlu2 %779 }
 0x10e   : > { %1481 = vrot.lane.b32.xlu0 %v2472_v36, %s2212_s10  ;;  %v1380_v36 = vrot.slane %v2555_v56, 7 }
 0x10f   : > { %1487 = vrot.lane.b32.xlu1 %v2526_v50, %s2212_s10 }
 0x110   : > { %v778_v40 = vpop.permute.xlu0 %777  ;;  %v2869_v54 = vsel %vm623_vm2, %v1379_v44, %v1380_v36 }
 0x111   : > { %v1038_v41 = vpop.permute.xlu1 %1037  ;;  %v838_v52 = vsel %vm833_vm3, %v821_v15, %v778_v40 }
 0x112   : > { %v1097_v45 = vsel %vm833_vm3, %v1081_v38, %v1038_v41  ;;  %2074 = vmatmul.msk.f32.gmra.mxu1 %vm1113_vm4, %v838_v52  ;;  %1537 = vrot.lane.b32.xlu2 %v2482_v39, %s2213_s24  ;;  %v1383_v41 = vrot.slane %v2654_v29, 7 }
 0x113   : > { %2058 = vmatmul.msk.f32.gmra.mxu0 %vm1113_vm4, %v1097_v45 }
 0x114   : > { %v1474_v50 = vpop.permute.xlu2 %1473  ;;  %v2954_v45 = vsel %vm623_vm2, %v1382_v4, %v1383_v41 }
 0x116   : > { %1543 = vrot.lane.b32.xlu0 %v2564_v59, %s2213_s24 }
 0x117   : > { %733 = vrot.lane.b32.xlu1 %v2652_v27, %s2212_s10 }
 0x118   : > { %v1472_v56 = vpop.permute.xlu0 %1471 }
 0x119   : > { %v794_v60 = vpop.permute.xlu1 %793  ;;  %v1570_v39 = vsel %vm541_vm0, %v2869_v54, %v1472_v56 }
 0x11a   : > { %v846_v20 = vsel %vm833_vm3, %v829_v58, %v794_v60  ;;  %v1586_v59 = vsel %vm833_vm3, %v1570_v39, %v1528_v49  ;;  %993 = vrot.lane.b32.xlu2 %v2613_v8, %s2212_s10  ;;  %v1442_v8 = vrot.slane %v2889_v11, 1 }
 0x11b   : > { %2082 = vmatmul.msk.f32.vlgmr.msrb.gmra.mxu3 %vm1113_vm4, %v846_v20  ;;  %2094 = vmatmul.msk.f32.gmra.mxu2 %vm1113_vm4, %v1586_v59 }
 0x11c   : > { %v726_v61 = vpop.permute.xlu2 %725 }
 0x11d   : > { %v823_v0 = vsel %vm541_vm0, %v2749_v26, %v726_v61 }
 0x11e   : > { %789 = vrot.lane.b32.xlu0 %v2683_v51, %s2213_s24 }
 0x11f   : > { %1049 = vrot.lane.b32.xlu1 %v2626_v13, %s2213_s24  ;;  %v1443_v13 = vrot.slane %v2891_v12, 1 }
 0x120   : > { %v724_v63 = vpop.permute.xlu0 %723 }
 0x121   : > { %v984_v2 = vpop.permute.xlu1 %983  ;;  %v822_v43 = vsel %vm541_vm0, %v2701_v7, %v724_v63  ;;  %v1444_v48 = vsel %vm672_vm1, %v1442_v8, %v1443_v13  ;;  %v1460_v31 = vsel %vm672_vm1, %v1443_v13, 0.0 }
 0x122   : > { %v839_v10 = vsel %vm833_vm3, %v822_v43, %v780_v37  ;;  %1483 = vrot.lane.b32.xlu2 %v2470_v35, %s2212_s10  ;;  %v1082_v7 = vsel %vm541_vm0, %v2787_v22, %v984_v2  ;;  %v1386_v35 = vrot.slane %v2615_v9, 7 }
 0x123   : > { %2075 = vmatmul.msk.f32.gmra.mxu1 %vm1113_vm4, %v839_v10 }
 0x124   : > { %v1042_v51 = vpop.permute.xlu2 %1041  ;;  %v2910_v28 = vsel %vm623_vm2, %v642_v42, %v1386_v35 }
 0x126   : > { %1489 = vrot.lane.b32.xlu0 %v2889_v11, %s2212_s10 }
 0x127   : > { %1539 = vrot.lane.b32.xlu1 %v2507_v46, %s2213_s24  ;;  %v2913_v46 = vsel %vm623_vm2, 0.0, %v1382_v4 }
 0x128   : > { %v1040_v62 = vpop.permute.xlu0 %1039  ;;  %v1571_v18 = vsel %vm541_vm0, %v2913_v46, %v1474_v50 }
 0x129   : > { %v740_v14 = vpop.permute.xlu1 %739  ;;  %v1098_v24 = vsel %vm833_vm3, %v1082_v7, %v1040_v62 }
 0x12a   : > { %2059 = vmatmul.msk.f32.gmra.mxu0 %vm1113_vm4, %v1098_v24  ;;  %1545 = vrot.lane.b32.xlu2 %v1444_v48, %s2213_s24  ;;  %v830_v27 = vsel %vm541_vm0, %v2910_v28, %v740_v14 }
 0x12c   : > { %v798_v6 = vpop.permute.xlu2 %797 }
 0x12e   : > { %735 = vrot.lane.b32.xlu0 %v2654_v29, %s2212_s10 }
 0x12f   : > { %995 = vrot.lane.b32.xlu1 %v2615_v9, %s2212_s10 }
 0x130   : > { %v796_v3 = vpop.permute.xlu0 %795 }
 0x131   : > { %v1530_v21 = vpop.permute.xlu1 %1529  ;;  %v847_v16 = vsel %vm833_vm3, %v830_v27, %v796_v3  ;;  %v1292_v30 = vpop.f32.mrf.mxu1 }
 0x132   : > { %v1587_v19 = vsel %vm833_vm3, %v1571_v18, %v1530_v21  ;;  %2083 = vmatmul.msk.f32.gmra.mxu3 %vm1113_vm4, %v847_v16  ;;  %791 = vrot.lane.b32.xlu2 %v2737_v1, %s2213_s24 }
 0x133   : > { %2095 = vmatmul.msk.f32.gmra.mxu2 %vm1113_vm4, %v1587_v19 }
 0x134   : > { %v988_v9 = vpop.permute.xlu2 %987 }
 0x135   : > { %v1084_v59 = vsel %vm541_vm0, %v2869_v54, %v988_v9 }
 0x136   : > { %1051 = vrot.lane.b32.xlu0 %v2680_v47, %s2213_s24 }
 0x137   : > { %1491 = vrot.lane.b32.xlu1 %v2891_v12, %s2212_s10 }
 0x138   : > { %v986_v23 = vpop.permute.xlu0 %985 }
 0x139   : > { %v782_v44 = vpop.permute.xlu1 %781  ;;  %v1083_v49 = vsel %vm541_vm0, %v2833_v53, %v986_v23  ;;  %v1179_v55 = vpop.f32.mrf.mxu0 }
 0x13a   : > { %v840_v1 = vsel %vm833_vm3, %v823_v0, %v782_v44  ;;  %v1099_v47 = vsel %vm833_vm3, %v1083_v49, %v1042_v51  ;;  %1547 = vrot.lane.b32.xlu2 %v1460_v31, %s2213_s24  ;;  %v1293_v26 = vadd.f32 %v1292_v30, %v1179_v55 }
 0x13b   : > { %2076 = vmatmul.msk.f32.gmra.mxu1 %vm1113_vm4, %v840_v1  ;;  %2060 = vmatmul.msk.f32.gmra.mxu0 %vm1113_vm4, %v1099_v47 }
 0x13c   : > { %v744_v34 = vpop.permute.xlu2 %743 }
 0x13d   : > { %v1666_v33 = vpop.f32.mrf.mxu2  ;;  %v832_v51 = vsel %vm541_vm0, %v2742_v25, %v744_v34 }
 0x13e   : > { %v2943_v37 = vadd.f32 %v1666_v33, %v1293_v26 }
 0x140   : > { %1807 = vst.msk [vmem:[%s2313_s23] sm:$0xff] %vm541_vm0, %v2943_v37  ;;  %v742_v15 = vpop.permute.xlu0 %741 }
 0x141   : > { %v1476_v38 = vpop.permute.xlu1 %1475  ;;  %v831_v40 = vsel %vm541_vm0, %v2690_v57, %v742_v15 }
 0x142   : > { %v848_v42 = vsel %vm833_vm3, %v831_v40, %v798_v6  ;;  %v1572_v36 = vsel %vm541_vm0, %v2954_v45, %v1476_v38 }
 0x143   : > { %2084 = vmatmul.msk.f32.gmra.mxu3 %vm1113_vm4, %v848_v42 }
 0x144   : > { %v1534_v52 = vpop.permute.xlu2 %1533 }
 0x148   : > { %v1532_v50 = vpop.permute.xlu0 %1531 }
 0x149   : > { %v728_v58 = vpop.permute.xlu1 %727  ;;  %v1588_v56 = vsel %vm833_vm3, %v1572_v36, %v1532_v50 }
 0x14a   : > { %2096 = vmatmul.msk.f32.gmra.mxu2 %vm1113_vm4, %v1588_v56  ;;  %v824_v20 = vsel %vm541_vm0, %v2787_v22, %v728_v58 }
 0x14c   : > { %v786_v60 = vpop.permute.xlu2 %785 }
 0x14d   : > { %v1669_v43 = vpop.f32.mrf.mxu2 }
 0x14f   : > { %v1295_v39 = vpop.f32.mrf.mxu1 }
 0x150   : > { %v1182_v29 = vpop.f32.mrf.mxu0  ;;  %v784_v63 = vpop.permute.xlu0 %783 }
 0x151   : > { %v1296_v61 = vadd.f32 %v1295_v39, %v1182_v29  ;;  %v1044_v2 = vpop.permute.xlu1 %1043  ;;  %v841_v8 = vsel %vm833_vm3, %v824_v20, %v784_v63 }
 0x152   : > { %v1100_v10 = vsel %vm833_vm3, %v1084_v59, %v1044_v2  ;;  %2077 = vmatmul.msk.f32.gmra.mxu1 %vm1113_vm4, %v841_v8 }
 0x153   : > { %v2966_v13 = vadd.f32 %v1669_v43, %v1296_v61  ;;  %2061 = vmatmul.msk.f32.gmra.mxu0 %vm1113_vm4, %v1100_v10 }
 0x154   : > { %v1486_v22 = vpop.permute.xlu2 %1485 }
 0x155   : > { %1808 = vst.msk [vmem:[%s2313_s23 + $0x8] sm:$0xff] %vm541_vm0, %v2966_v13  ;;  %v1577_v55 = vsel %vm541_vm0, %v2784_v5, %v1486_v22 }
 0x158   : > { %v1478_v7 = vpop.permute.xlu0 %1477 }
 0x159   : > { %v800_v62 = vpop.permute.xlu1 %799  ;;  %v1573_v14 = vsel %vm541_vm0, %v2862_v32, %v1478_v7 }
 0x15a   : > { %v849_v48 = vsel %vm833_vm3, %v832_v51, %v800_v62  ;;  %v1589_v35 = vsel %vm833_vm3, %v1573_v14, %v1534_v52 }
 0x15b   : > { %2085 = vmatmul.msk.f32.gmra.mxu3 %vm1113_vm4, %v849_v48  ;;  %2097 = vmatmul.msk.f32.gmra.mxu2 %vm1113_vm4, %v1589_v35  ;;  %v1394_v35 = vrot.slane %v2889_v11, 7 }
 0x15c   : > { %v732_v4 = vpop.permute.xlu2 %731 }
 0x15d   : > { %v826_v15 = vsel %vm541_vm0, %v2869_v54, %v732_v4 }
 0x15e   : > { %v1672_v23 = vpop.f32.mrf.mxu2 }
 0x160   : > { %v730_v24 = vpop.permute.xlu0 %729  ;;  %v1298_v3 = vpop.f32.mrf.mxu1 }
 0x161   : > { %v990_v6 = vpop.permute.xlu1 %989  ;;  %v825_v27 = vsel %vm541_vm0, %v2833_v53, %v730_v24 }
 0x162   : > { %v842_v18 = vsel %vm833_vm3, %v825_v27, %v786_v60  ;;  %v1085_v16 = vsel %vm541_vm0, %v2913_v46, %v990_v6 }
 0x163   : > { %2078 = vmatmul.msk.f32.gmra.mxu1 %vm1113_vm4, %v842_v18 }
 0x164   : > { %v1048_v31 = vpop.permute.xlu2 %1047 }
 0x167   : > { %v1185_v21 = vpop.f32.mrf.mxu0 }
 0x168   : > { %v1299_v19 = vadd.f32 %v1298_v3, %v1185_v21  ;;  %v1046_v9 = vpop.permute.xlu0 %1045 }
 0x169   : > { %v1480_v0 = vpop.permute.xlu1 %1479  ;;  %v1101_v44 = vsel %vm833_vm3, %v1085_v16, %v1046_v9 }
 0x16a   : > { %v2988_v49 = vadd.f32 %v1672_v23, %v1299_v19  ;;  %2062 = vmatmul.msk.f32.gmra.mxu0 %vm1113_vm4, %v1101_v44  ;;  %v1574_v53 = vsel %vm541_vm0, %v2910_v28, %v1480_v0 }
 0x16c   : > { %1809 = vst.msk [vmem:[%s2313_s23 + $0x10] sm:$0xff] %vm541_vm0, %v2988_v49  ;;  %v1538_v33 = vpop.permute.xlu2 %1537 }
 0x170   : > { %v1536_v1 = vpop.permute.xlu0 %1535 }
 0x171   : > { %v1542_v47 = vpop.permute.xlu1 %1541  ;;  %v1590_v26 = vsel %vm833_vm3, %v1574_v53, %v1536_v1 }
 0x172   : > { %v1593_v30 = vsel %vm833_vm3, %v1577_v55, %v1542_v47  ;;  %2098 = vmatmul.msk.f32.gmra.mxu2 %vm1113_vm4, %v1590_v26 }
 0x173   : > { %2101 = vmatmul.msk.f32.vlgmr.msra.gmra.mxu3 %vm1113_vm4, %v1593_v30 }
 0x174   : > { %v994_v56 = vpop.permute.xlu2 %993 }
 0x175   : > { %v1087_v8 = vsel %vm541_vm0, %v2862_v32, %v994_v56  ;;  %v1420_v32 = vsel %vm623_vm2, 0.0, %v1394_v35 }
 0x176   : > { %v1675_v50 = vpop.f32.mrf.mxu2 }
 0x178   : > { %v1301_v34 = vpop.f32.mrf.mxu1  ;;  %v992_v38 = vpop.permute.xlu0 %991 }
 0x179   : > { %v788_v40 = vpop.permute.xlu1 %787  ;;  %v1086_v5 = vsel %vm541_vm0, %v2954_v45, %v992_v38  ;;  %v1188_v41 = vpop.f32.mrf.mxu0 }
 0x17a   : > { %v843_v42 = vsel %vm833_vm3, %v826_v15, %v788_v40  ;;  %v1302_v52 = vadd.f32 %v1301_v34, %v1188_v41  ;;  %v1102_v36 = vsel %vm833_vm3, %v1086_v5, %v1048_v31 }
 0x17b   : > { %2079 = vmatmul.msk.f32.gmra.mxu1 %vm1113_vm4, %v843_v42  ;;  %2063 = vmatmul.msk.f32.gmra.mxu0 %vm1113_vm4, %v1102_v36 }
 0x17c   : > { %v3010_v58 = vadd.f32 %v1675_v50, %v1302_v52  ;;  %v1484_v20 = vpop.permute.xlu2 %1483 }
 0x17d   : > { %v1576_v4 = vsel %vm541_vm0, %v2742_v25, %v1484_v20  ;;  %v1395_v25 = vrot.slane %v2891_v12, 7 }
 0x17e   : > { %1810 = vst.msk [vmem:[%s2313_s23 + $0x18] sm:$0xff] %vm541_vm0, %v3010_v58 }
 0x17f   : > { %v1396_v0 = vsel %vm623_vm2, %v1394_v35, %v1395_v25 }
 0x180   : > { %v1482_v54 = vpop.permute.xlu0 %1481 }
 0x181   : > { %v1488_v60 = vpop.permute.xlu1 %1487  ;;  %v1575_v29 = vsel %vm541_vm0, %v2690_v57, %v1482_v54 }
 0x182   : > { %v1591_v39 = vsel %vm833_vm3, %v1575_v29, %v1538_v33  ;;  %v1578_v59 = vsel %vm541_vm0, %v2823_v17, %v1488_v60 }
 0x183   : > { %2099 = vmatmul.msk.f32.gmra.mxu2 %vm1113_vm4, %v1591_v39 }
 0x188   : > { %v1544_v61 = vpop.permute.xlu0 %1543 }
 0x189   : > { %v734_v63 = vpop.permute.xlu1 %733  ;;  %v1594_v2 = vsel %vm833_vm3, %v1578_v59, %v1544_v61 }
 0x18a   : > { %2102 = vmatmul.msk.f32.gmra.mxu3 %vm1113_vm4, %v1594_v2  ;;  %v827_v57 = vsel %vm541_vm0, %v2913_v46, %v734_v63  ;;  %v1546_v46 = vpop.permute.xlu2 %1545 }
 0x18d   : > { %v1678_v62 = vpop.f32.mrf.mxu2 }
 0x18f   : > { %v1304_v10 = vpop.f32.mrf.mxu1 }
 0x190   : > { %v1191_v43 = vpop.f32.mrf.mxu0  ;;  %v790_v51 = vpop.permute.xlu0 %789 }
 0x191   : > { %v1305_v22 = vadd.f32 %v1304_v10, %v1191_v43  ;;  %v1050_v7 = vpop.permute.xlu1 %1049  ;;  %v844_v14 = vsel %vm833_vm3, %v827_v57, %v790_v51 }
 0x192   : > { %v1103_v17 = vsel %vm833_vm3, %v1087_v8, %v1050_v7  ;;  %2080 = vmatmul.msk.f32.gmra.mxu1 %vm1113_vm4, %v844_v14  ;;  %v792_v11 = vpop.permute.xlu2 %791 }
 0x193   : > { %v3029_v48 = vadd.f32 %v1678_v62, %v1305_v22  ;;  %2064 = vmatmul.msk.f32.gmra.mxu0 %vm1113_vm4, %v1103_v17 }
 0x195   : > { %1811 = vst.msk [vmem:[%s2313_s23 + $0x20] sm:$0xff] %vm541_vm0, %v3029_v48 }
 0x198   : > { %v1490_v24 = vpop.permute.xlu0 %1489 }
 0x199   : > { %v1540_v6 = vpop.permute.xlu1 %1539  ;;  %v1579_v27 = vsel %vm541_vm0, %v1420_v32, %v1490_v24 }
 0x19a   : > { %v1592_v18 = vsel %vm833_vm3, %v1576_v4, %v1540_v6  ;;  %v1595_v3 = vsel %vm833_vm3, %v1579_v27, %v1546_v46  ;;  %v1548_v23 = vpop.permute.xlu2 %1547 }
 0x19b   : > { %2100 = vmatmul.msk.f32.gmra.mxu2 %vm1113_vm4, %v1592_v18  ;;  %2103 = vmatmul.msk.f32.gmra.mxu3 %vm1113_vm4, %v1595_v3  ;;  %v1730_v3 = vadd.f32 %v2966_v13, %v2943_v37 }
 0x1a0   : > { %v736_v21 = vpop.permute.xlu0 %735  ;;  %v1307_v44 = vpop.f32.mrf.mxu1 }
 0x1a1   : > { %v996_v16 = vpop.permute.xlu1 %995  ;;  %v828_v19 = vsel %vm541_vm0, %v2954_v45, %v736_v21  ;;  %v1681_v45 = vpop.f32.mrf.mxu2 }
 0x1a2   : > { %v845_v9 = vsel %vm833_vm3, %v828_v19, %v792_v11  ;;  %v1088_v53 = vsel %vm541_vm0, %v2910_v28, %v996_v16  ;;  %v1215_v28 = vpop.f32.mrf.mxu3  ;;  %v1731_v11 = vadd.f32 %v1730_v3, %v2988_v49 }
 0x1a3   : > { %2081 = vmatmul.msk.f32.gmra.mxu1 %vm1113_vm4, %v845_v9 }
 0x1a4   : > { %v1732_v21 = vadd.f32 %v1731_v11, %v3010_v58 }
 0x1a6   : > { %v1733_v19 = vadd.f32 %v1732_v21, %v3029_v48 }
 0x1a7   : > { %v1194_v31 = vpop.f32.mrf.mxu0 }
 0x1a8   : > { %v1308_v55 = vadd.f32 %v1307_v44, %v1194_v31  ;;  %v1052_v1 = vpop.permute.xlu0 %1051 }
 0x1a9   : > { %v1492_v47 = vpop.permute.xlu1 %1491  ;;  %v1104_v30 = vsel %vm833_vm3, %v1088_v53, %v1052_v1 }
 0x1aa   : > { %v1580_v12 = vsel %vm541_vm0, %v1396_v0, %v1492_v47  ;;  %v3055_v26 = vadd.f32 %v1681_v45, %v1308_v55  ;;  %2065 = vmatmul.msk.f32.gmra.mxu0 %vm1113_vm4, %v1104_v30  ;;  %v1218_v41 = vpop.f32.mrf.mxu3 }
 0x1ab   : > { %v1596_v33 = vsel %vm833_vm3, %v1580_v12, %v1548_v23 }
 0x1ac   : > { %2104 = vmatmul.msk.f32.gmra.mxu3 %vm1113_vm4, %v1596_v33  ;;  %1812 = vst.msk [vmem:[%s2313_s23 + $0x28] sm:$0xff] %vm541_vm0, %v3055_v26  ;;  %v1734_v0 = vadd.f32 %v1733_v19, %v3055_v26 }
 0x1b2   : > { %v1221_v42 = vpop.f32.mrf.mxu3 }
 0x1b6   : > { %v1684_v40 = vpop.f32.mrf.mxu2 }
 0x1b8   : > { %v1310_v34 = vpop.f32.mrf.mxu1  ;;  %v1197_v15 = vpop.f32.mrf.mxu0 }
 0x1b9   : > { %v1311_v38 = vadd.f32 %v1310_v34, %v1197_v15 }
 0x1ba   : > { %v1224_v52 = vpop.f32.mrf.mxu3 }
 0x1bb   : > { %v3063_v5 = vadd.f32 %v1684_v40, %v1311_v38 }
 0x1bd   : > { %1813 = vst.msk [vmem:[%s2313_s23 + $0x30] sm:$0xff] %vm541_vm0, %v3063_v5  ;;  %v1735_v23 = vadd.f32 %v1734_v0, %v3063_v5 }
 0x1c2   : > { %v1328_v29 = vpop.f32.mrf.mxu3 }
 0x1c3   : > { %v1329_v57 = vadd.f32 %v1328_v29, %v1215_v28 }
 0x1ca   : > { %v1331_v39 = vpop.f32.mrf.mxu3 }
 0x1cb   : > { %v1332_v35 = vadd.f32 %v1331_v39, %v1218_v41 }
 0x1cd   : > { %v1687_v54 = vpop.f32.mrf.mxu2 }
 0x1cf   : > { %v1313_v50 = vpop.f32.mrf.mxu1 }
 0x1d0   : > { %v1200_v36 = vpop.f32.mrf.mxu0 }
 0x1d1   : > { %v1314_v56 = vadd.f32 %v1313_v50, %v1200_v36 }
 0x1d2   : > { %v1334_v20 = vpop.f32.mrf.mxu3 }
 0x1d3   : > { %v3068_v60 = vadd.f32 %v1687_v54, %v1314_v56  ;;  %v1335_v16 = vadd.f32 %v1334_v20, %v1221_v42 }
 0x1d5   : > { %1814 = vst.msk [vmem:[%s2313_s23 + $0x38] sm:$0xff] %vm541_vm0, %v3068_v60  ;;  %v1736_v44 = vadd.f32 %v1735_v23, %v3068_v60 }
 0x1de   : > { %v1690_v2 = vpop.f32.mrf.mxu2  ;;  %v1337_v10 = vpop.f32.mrf.mxu3 }
 0x1df   : > { %v1338_v28 = vadd.f32 %v1337_v10, %v1224_v52 }
 0x1e0   : > { %v1316_v59 = vpop.f32.mrf.mxu1 }
 0x1e7   : > { %v1203_v61 = vpop.f32.mrf.mxu0 }
 0x1e8   : > { %v1317_v63 = vadd.f32 %v1316_v59, %v1203_v61 }
 0x1ea   : > { %v3073_v43 = vadd.f32 %v1690_v2, %v1317_v63 }
 0x1ec   : > { %1815 = vst.msk [vmem:[%s2313_s23 + $0x40] sm:$0xff] %vm541_vm0, %v3073_v43  ;;  %v1737_v31 = vadd.f32 %v1736_v44, %v3073_v43 }
 0x1f5   : > { %v1693_v17 = vpop.f32.mrf.mxu2 }
 0x1f6   : > { %v1702_v8 = vpop.f32.mrf.mxu3 }
 0x1f7   : > { %v3078_v22 = vadd.f32 %v1702_v8, %v1329_v57 }
 0x1f8   : > { %v1319_v51 = vpop.f32.mrf.mxu1  ;;  %v1206_v7 = vpop.f32.mrf.mxu0 }
 0x1f9   : > { %1819 = vst.msk [vmem:[%s2313_s23 + $0x60] sm:$0xff] %vm541_vm0, %v3078_v22  ;;  %v1320_v62 = vadd.f32 %v1319_v51, %v1206_v7 }
 0x1fb   : > { %v3083_v14 = vadd.f32 %v1693_v17, %v1320_v62 }
 0x1fd   : > { %1816 = vst.msk [vmem:[%s2313_s23 + $0x48] sm:$0xff] %vm541_vm0, %v3083_v14  ;;  %v1738_v1 = vadd.f32 %v1737_v31, %v3083_v14 }
 0x206   : > { %v1696_v27 = vpop.f32.mrf.mxu2 }
 0x20d   : > { %v1705_v46 = vpop.f32.mrf.mxu3 }
 0x20e   : > { %v3088_v32 = vadd.f32 %v1705_v46, %v1332_v35 }
 0x20f   : > { %v1322_v24 = vpop.f32.mrf.mxu1 }
 0x210   : > { %v1209_v4 = vpop.f32.mrf.mxu0  ;;  %1820 = vst.msk [vmem:[%s2313_s23 + $0x68] sm:$0xff] %vm541_vm0, %v3088_v32 }
 0x211   : > { %v1323_v6 = vadd.f32 %v1322_v24, %v1209_v4 }
 0x213   : > { %v1724_v18 = vadd.f32 %v1696_v27, %v1323_v6 }
 0x215   : > { %1817 = vst.msk [vmem:[%s2313_s23 + $0x50] sm:$0xff] %vm541_vm0, %v1724_v18  ;;  %v1739_v12 = vadd.f32 %v1738_v1, %v1724_v18 }
 0x21e   : > { %v1708_v25 = vpop.f32.mrf.mxu3  ;;  %v1699_v45 = vpop.f32.mrf.mxu2 }
 0x21f   : > { %v3100_v9 = vadd.f32 %v1708_v25, %v1335_v16 }
 0x220   : > { %v1325_v53 = vpop.f32.mrf.mxu1 }
 0x221   : > { %1821 = vst.msk [vmem:[%s2313_s23 + $0x70] sm:$0xff] %vm541_vm0, %v3100_v9 }
 0x227   : > { %v1212_v55 = vpop.f32.mrf.mxu0 }
 0x228   : > { %v1326_v47 = vadd.f32 %v1325_v53, %v1212_v55 }
 0x22a   : > { %v1725_v30 = vadd.f32 %v1699_v45, %v1326_v47 }
 0x22c   : > { %v1740_v33 = vadd.f32 %v1739_v12, %v1725_v30  ;;  %1818 = vst.msk [vmem:[%s2313_s23 + $0x58] sm:$0xff] %vm541_vm0, %v1725_v30 }
 0x22e   : > { %v1741_v34 = vadd.f32 %v1740_v33, %v3078_v22 }
 0x22f   : > { %v1711_v15 = vpop.f32.mrf.mxu3 }
 0x230   : > { %v1729_v38 = vadd.f32 %v1711_v15, %v1338_v28  ;;  %v1742_v40 = vadd.f32 %v1741_v34, %v3088_v32 }
 0x232   : > { %1822 = vst.msk [vmem:[%s2313_s23 + $0x78] sm:$0xff] %vm541_vm0, %v1729_v38  ;;  %v1743_v41 = vadd.f32 %v1742_v40, %v3100_v9 }
 0x234   : > { %v1744_v42 = vadd.f32 %v1743_v41, %v1729_v38 }
 0x236   : > { %v1745_v36 = vrot.slane %v1744_v42, 4 }
 0x238   : > { %v1746_v50 = vadd.f32 %v1745_v36, %v1744_v42 }
 0x23a   : > { %v1747_v56 = vrot.slane %v1746_v50, 2 }
 0x23c   : > { %v1748_v54 = vadd.f32 %v1747_v56, %v1746_v50 }
 0x23e   : > { %v1749_v29 = vrot.slane %v1748_v54, 1 }
 0x240   : > { %v1750_v39 = vadd.f32 %v1749_v29, %v1748_v54 }
 0x242   : > { %v1751_v20 = vmul.f32 0.0078125, %v1750_v39 }
 0x244   : > { %v1752_v52 = vsub.f32 %v2943_v37, %v1751_v20  ;;  %v1753_v59 = vsub.f32 %v2966_v13, %v1751_v20  ;;  %v1754_v61 = vsub.f32 %v2988_v49, %v1751_v20  ;;  %v1755_v10 = vsub.f32 %v3010_v58, %v1751_v20 }
 0x245   : > { %v1756_v57 = vsub.f32 %v3029_v48, %v1751_v20  ;;  %v1757_v7 = vsub.f32 %v3055_v26, %v1751_v20  ;;  %v1758_v35 = vsub.f32 %v3063_v5, %v1751_v20  ;;  %v1759_v13 = vsub.f32 %v3068_v60, %v1751_v20 }
 0x246   : > { %v1768_v63 = vmul.f32 %v1752_v52, %v1752_v52  ;;  %v1769_v2 = vmul.f32 %v1753_v59, %v1753_v59  ;;  %v1770_v8 = vmul.f32 %v1754_v61, %v1754_v61  ;;  %v1771_v62 = vmul.f32 %v1755_v10, %v1755_v10 }
 0x247   : > { %v1772_v46 = vmul.f32 %v1756_v57, %v1756_v57  ;;  %v1773_v4 = vmul.f32 %v1757_v7, %v1757_v7  ;;  %v1760_v24 = vsub.f32 %v3073_v43, %v1751_v20  ;;  %v1774_v6 = vmul.f32 %v1758_v35, %v1758_v35 }
 0x248   : > { %v1784_v51 = vadd.f32 %v1769_v2, %v1768_v63  ;;  %v1761_v48 = vsub.f32 %v3083_v14, %v1751_v20  ;;  %v1775_v27 = vmul.f32 %v1759_v13, %v1759_v13  ;;  %v1762_v11 = vsub.f32 %v1724_v18, %v1751_v20 }
 0x249   : > { %v1776_v26 = vmul.f32 %v1760_v24, %v1760_v24  ;;  %v1763_v16 = vsub.f32 %v1725_v30, %v1751_v20  ;;  %v1764_v25 = vsub.f32 %v3078_v22, %v1751_v20  ;;  %v1765_v23 = vsub.f32 %v3088_v32, %v1751_v20 }
 0x24a   : > { %v1785_v17 = vadd.f32 %v1784_v51, %v1770_v8  ;;  %v1777_v19 = vmul.f32 %v1761_v48, %v1761_v48  ;;  %v1778_v0 = vmul.f32 %v1762_v11, %v1762_v11  ;;  %v1766_v31 = vsub.f32 %v3100_v9, %v1751_v20 }
 0x24b   : > { %v1779_v44 = vmul.f32 %v1763_v16, %v1763_v16  ;;  %v1780_v53 = vmul.f32 %v1764_v25, %v1764_v25  ;;  %v1767_v55 = vsub.f32 %v1729_v38, %v1751_v20  ;;  %v1781_v18 = vmul.f32 %v1765_v23, %v1765_v23 }
 0x24c   : > { %v1786_v37 = vadd.f32 %v1785_v17, %v1771_v62  ;;  %v1782_v47 = vmul.f32 %v1766_v31, %v1766_v31 }
 0x24d   : > { %v1783_v12 = vmul.f32 %v1767_v55, %v1767_v55 }
 0x24e   : > { %v1787_v49 = vadd.f32 %v1786_v37, %v1772_v46 }
 0x250   : > { %v1788_v58 = vadd.f32 %v1787_v49, %v1773_v4 }
 0x252   : > { %v1789_v3 = vadd.f32 %v1788_v58, %v1774_v6 }
 0x254   : > { %v1790_v21 = vadd.f32 %v1789_v3, %v1775_v27 }
 0x256   : > { %v1791_v5 = vadd.f32 %v1790_v21, %v1776_v26 }
 0x258   : > { %v1792_v60 = vadd.f32 %v1791_v5, %v1777_v19 }
 0x25a   : > { %v1793_v43 = vadd.f32 %v1792_v60, %v1778_v0 }
 0x25c   : > { %v1794_v14 = vadd.f32 %v1793_v43, %v1779_v44 }
 0x25e   : > { %v1795_v1 = vadd.f32 %v1794_v14, %v1780_v53 }
 0x260   : > { %v1796_v45 = vadd.f32 %v1795_v1, %v1781_v18 }
 0x262   : > { %v1797_v30 = vadd.f32 %v1796_v45, %v1782_v47 }
 0x264   : > { %v1798_v33 = vadd.f32 %v1797_v30, %v1783_v12 }
 0x266   : > { %v1799_v22 = vrot.slane %v1798_v33, 4 }
 0x268   : > { %v1800_v28 = vadd.f32 %v1799_v22, %v1798_v33 }
 0x26a   : > { %v1801_v34 = vrot.slane %v1800_v28, 2 }
 0x26c   : > { %v1802_v15 = vadd.f32 %v1801_v34, %v1800_v28 }
 0x26e   : > { %v1803_v32 = vrot.slane %v1802_v15, 1 }
 0x270   : > { %v1804_v40 = vadd.f32 %v1803_v32, %v1802_v15 }
 0x272   : > { %v1805_v41 = vsel %vm623_vm2, %v1750_v39, %v1804_v40 }
 0x273   : > { %1806 = vst [vmem:[%s2355_s19] sm:$0x3] %v1805_v41 }
 0x274 PF: > { %s18_s28 = sadd.s32 1, %s2208_s28   ;;  %s3156_s24 = smov %s2200_s26 }
 0x275   : > { %p15_p13 = scmp.ge.s32.totalorder %s18_s28, 6   ;;  %s3157_s25 = smov %s2204_s27 }
 0x276   : > { %s3158_s26 = smov %s3161_s29  ;;  %s3159_s27 = smov %s3165_s30 }
 0x277   :  { %17 = sbr.rel (!%p15_p13) target bundleno = 3 (0x3), region = 105 }

</bundles_post_ra>
